<compile_context>
chip_gen: v6e
topology: v6e:2x2x1
jax: 0.10.0
libtpu: 0.0.40
codegen_flags: <defaults>
</compile_context>

<pallas_src>
import functools

import jax
import jax.numpy as jnp
from jax.experimental import pallas as pl
from jax.experimental.pallas import tpu as pltpu

IN_FEATURES = 784
H1, H2, H3 = 512, 256, 128
NUM_CLASSES = 10
PAD_OUT = 128            # lane-dense output slab
NEG_INF = -1e30


def _pick_defaults():
    """Per-generation batch tile and scoped-VMEM limit."""
    try:
        kind = jax.devices()[0].device_kind.lower()
    except Exception:  # pragma: no cover - e.g. no devices during tracing envs
        kind = ""
    if "v7" in kind:
        # v7x: 64 MiB physical VMEM per TC -> smaller tile, <=48 MiB scoped.
        return 1024, 48 * 1024 * 1024
    # v5e / v6e (128 MiB physical VMEM): big tiles amortize grid-step overhead.
    return 2048, 64 * 1024 * 1024


_DEF_TILE_B, _DEF_VMEM_LIMIT = _pick_defaults()


def fc_kernel(x_ref, w1_ref, b1_ref, w2_ref, b2_ref,
              w3_ref, b3_ref, w4_ref, b4_ref, o_ref):
    # Layer 1: bf16 matmul on the MXU, f32 accumulate, f32 bias + ReLU.
    x = x_ref[...]
    if x.dtype != jnp.bfloat16:          # static (trace-time) branch
        x = x.astype(jnp.bfloat16)
    h = jnp.dot(x, w1_ref[...], preferred_element_type=jnp.float32) + b1_ref[...]
    h = jnp.maximum(h, 0.0)

    h = jnp.dot(h.astype(jnp.bfloat16), w2_ref[...],
                preferred_element_type=jnp.float32) + b2_ref[...]
    h = jnp.maximum(h, 0.0)

    h = jnp.dot(h.astype(jnp.bfloat16), w3_ref[...],
                preferred_element_type=jnp.float32) + b3_ref[...]
    h = jnp.maximum(h, 0.0)

    # Padded class columns carry a -1e30 bias (baked in prepare_params), so the
    # mask costs zero VPU ops here and exp underflows to exactly 0 for them.
    logits = jnp.dot(h.astype(jnp.bfloat16), w4_ref[...],
                     preferred_element_type=jnp.float32) + b4_ref[...]

    # Stable softmax in f32 with exact normalization (rows sum to 1).
    m = jnp.max(logits, axis=-1, keepdims=True)
    e = jnp.exp(logits - m)
    s = jnp.sum(e, axis=-1, keepdims=True)
    o_ref[...] = e / s


def prepare_params(params):
    """Cast matmul weights to bf16 and bake the class-pad mask into b4 (once)."""
    (w1, b1), (w2, b2), (w3, b3), (w4, b4) = params
    w1p = w1.astype(jnp.bfloat16)                       # (784, 512), no pad
    w2p = w2.astype(jnp.bfloat16)                       # (512, 256)
    w3p = w3.astype(jnp.bfloat16)                       # (256, 128)
    w4p = jnp.pad(w4.astype(jnp.float32),
                  ((0, 0), (0, PAD_OUT - NUM_CLASSES))).astype(jnp.bfloat16)
    b1p = b1.astype(jnp.float32).reshape(1, H1)
    b2p = b2.astype(jnp.float32).reshape(1, H2)
    b3p = b3.astype(jnp.float32).reshape(1, H3)
    # Columns 10..127 get -1e30 so padded logits vanish in the softmax.
    b4p = jnp.pad(b4.astype(jnp.float32).reshape(1, NUM_CLASSES),
                  ((0, 0), (0, PAD_OUT - NUM_CLASSES)),
                  constant_values=NEG_INF)
    return (w1p, b1p, w2p, b2p, w3p, b3p, w4p, b4p)


@functools.partial(jax.jit, static_argnames=("tile_b", "vmem_limit_bytes"))
def fc_forward(x, prepped, tile_b=_DEF_TILE_B, vmem_limit_bytes=_DEF_VMEM_LIMIT):
    """x: [B, C, H, W] (flattens to 784). Returns softmax probabilities [B, 10]."""
    B = x.shape[0]
    x_flat = x.reshape(B, -1)                      # x.view(x.size(0), -1)
    assert x_flat.shape[1] == IN_FEATURES
    # Keep bf16 producers bf16 (halves x DMA); otherwise stay f32 and cast
    # in-kernel (no standalone cast pass in the wrapper).
    if x_flat.dtype != jnp.bfloat16:
        x_flat = x_flat.astype(jnp.float32)

    # Batch tile: multiple of 8 sublanes, no bigger than the (padded) batch,
    # and at least 2 grid steps when possible so both v7x TCs get work.
    b8 = ((B + 7) // 8) * 8
    tb = max(8, min((tile_b // 8) * 8, b8))
    if b8 >= 16:
        half = ((pl.cdiv(b8, 2) + 7) // 8) * 8
        tb = min(tb, half)
    Bp = pl.cdiv(B, tb) * tb
    if Bp != B:
        x_flat = jnp.pad(x_flat, ((0, Bp - B), (0, 0)))

    w1p, b1p, w2p, b2p, w3p, b3p, w4p, b4p = prepped

    def const_spec(shape):
        # Same block every grid step -> stays resident in VMEM; single buffer.
        return pl.BlockSpec(shape, lambda i: (0, 0), pipeline_mode=pl.Buffered(1))

    grid = (Bp // tb,)

    weight_bytes = sum(int(a.size) * a.dtype.itemsize
                       for a in (w1p, b1p, w2p, b2p, w3p, b3p, w4p, b4p))
    x_bytes = int(Bp) * IN_FEATURES * x_flat.dtype.itemsize
    cost = pl.CostEstimate(
        flops=2 * Bp * (IN_FEATURES * H1 + H1 * H2 + H2 * H3 + H3 * PAD_OUT),
        transcendentals=Bp * PAD_OUT,
        bytes_accessed=weight_bytes + x_bytes + Bp * PAD_OUT * 4,
    )

    out = pl.pallas_call(
        fc_kernel,
        out_shape=jax.ShapeDtypeStruct((Bp, PAD_OUT), jnp.float32),
        grid=grid,
        in_specs=[
            # x tile: full 784-feature last dim (legal: equals the array dim).
            pl.BlockSpec((tb, IN_FEATURES), lambda i: (i, 0)),
            const_spec((IN_FEATURES, H1)), const_spec((1, H1)),
            const_spec((H1, H2)),          const_spec((1, H2)),
            const_spec((H2, H3)),          const_spec((1, H3)),
            const_spec((H3, PAD_OUT)),     const_spec((1, PAD_OUT)),
        ],
        out_specs=pl.BlockSpec((tb, PAD_OUT), lambda i: (i, 0)),
        compiler_params=pltpu.CompilerParams(
            dimension_semantics=("parallel",),     # both TCs on v7x
            vmem_limit_bytes=vmem_limit_bytes,
        ),
        cost_estimate=cost,
    )(x_flat, w1p, b1p, w2p, b2p, w3p, b3p, w4p, b4p)

    return out[:B, :NUM_CLASSES]


def init_linear(key, fan_in, fan_out):
    """Deterministic init mimicking torch.nn.Linear (U(-1/sqrt(in), 1/sqrt(in)))."""
    kw, kb = jax.random.split(key)
    bound = 1.0 / jnp.sqrt(float(fan_in))
    # stored as [in, out] so the kernel computes x @ W  (== x @ W_torch.T)
    w = jax.random.uniform(kw, (fan_in, fan_out), jnp.float32, -bound, bound)
    b = jax.random.uniform(kb, (1, fan_out), jnp.float32, -bound, bound)
    return w, b


def fc_reference(x, params):
    """Pure-JAX f32 reference of the PyTorch forward pass."""
    (w1, b1), (w2, b2), (w3, b3), (w4, b4) = params
    h = x.reshape(x.shape[0], -1).astype(jnp.float32)
    h = jnp.maximum(h @ w1 + b1, 0.0)
    h = jnp.maximum(h @ w2 + b2, 0.0)
    h = jnp.maximum(h @ w3 + b3, 0.0)
    return jax.nn.softmax(h @ w4 + b4, axis=-1)


if __name__ == "__main__":
    key = jax.random.PRNGKey(0)
    k_in, k1, k2, k3, k4 = jax.random.split(key, 5)

    params = (
        init_linear(k1, IN_FEATURES, H1),
        init_linear(k2, H1, H2),
        init_linear(k3, H2, H3),
        init_linear(k4, H3, NUM_CLASSES),
    )
    prepped = prepare_params(params)

    # Small MNIST-like input: batch=2, NCHW [2, 1, 28, 28] -> 784 features.
    x = jax.random.normal(k_in, (2, 1, 28, 28), jnp.float32)

    out = fc_forward(x, prepped)
    out = jax.block_until_ready(out)

    # Shape + exact softmax normalization checks.
    assert out.shape == (2, NUM_CLASSES)
    assert bool(jnp.all(out >= 0.0))
    assert jnp.allclose(jnp.sum(out, axis=-1), 1.0, atol=1e-3)

    # Loose agreement with the f32 reference (weights run in bf16 on the MXU).
    ref = fc_reference(x, params)
    assert jnp.allclose(out, ref, atol=3e-2)

    print("KERNEL_OK")
</pallas_src>

<mosaic_0001>
module attributes {stable_mosaic.version = 11 : i64} {
  func.func @fc_kernel(%arg0: i32, %arg1: memref<8x784xf32, #tpu.memory_space<vmem>>, %arg2: memref<784x512xbf16, #tpu.memory_space<vmem>>, %arg3: memref<1x512xf32, #tpu.memory_space<vmem>>, %arg4: memref<512x256xbf16, #tpu.memory_space<vmem>>, %arg5: memref<1x256xf32, #tpu.memory_space<vmem>>, %arg6: memref<256x128xbf16, #tpu.memory_space<vmem>>, %arg7: memref<1x128xf32, #tpu.memory_space<vmem>>, %arg8: memref<128x128xbf16, #tpu.memory_space<vmem>>, %arg9: memref<1x128xf32, #tpu.memory_space<vmem>>, %arg10: memref<8x128xf32, #tpu.memory_space<vmem>>) attributes {dimension_semantics = [#tpu.dimension_semantics<parallel>], iteration_bounds = array<i64: 1>, scalar_prefetch = 0 : i64, scratch_operands = 0 : i64, tpu.core_type = #tpu.core_type<tc>, window_params = [{transform_indices = @transform_0, window_bounds = array<i64: 8, 784>}, {pipeline_mode = #tpu.pipeline_mode<synchronous>, transform_indices = @transform_1, window_bounds = array<i64: 784, 512>}, {pipeline_mode = #tpu.pipeline_mode<synchronous>, transform_indices = @transform_2, window_bounds = array<i64: 1, 512>}, {pipeline_mode = #tpu.pipeline_mode<synchronous>, transform_indices = @transform_3, window_bounds = array<i64: 512, 256>}, {pipeline_mode = #tpu.pipeline_mode<synchronous>, transform_indices = @transform_4, window_bounds = array<i64: 1, 256>}, {pipeline_mode = #tpu.pipeline_mode<synchronous>, transform_indices = @transform_5, window_bounds = array<i64: 256, 128>}, {pipeline_mode = #tpu.pipeline_mode<synchronous>, transform_indices = @transform_6, window_bounds = array<i64: 1, 128>}, {pipeline_mode = #tpu.pipeline_mode<synchronous>, transform_indices = @transform_7, window_bounds = array<i64: 128, 128>}, {pipeline_mode = #tpu.pipeline_mode<synchronous>, transform_indices = @transform_8, window_bounds = array<i64: 1, 128>}, {transform_indices = @transform_9, window_bounds = array<i64: 8, 128>}]} {
    %c0 = arith.constant 0 : index
    %c0_0 = arith.constant 0 : index
    %0 = vector.load %arg1[%c0, %c0_0] : memref<8x784xf32, #tpu.memory_space<vmem>>, vector<8x784xf32>
    %1 = arith.truncf %0 : vector<8x784xf32> to vector<8x784xbf16>
    %c0_1 = arith.constant 0 : index
    %c0_2 = arith.constant 0 : index
    %2 = vector.load %arg2[%c0_1, %c0_2] : memref<784x512xbf16, #tpu.memory_space<vmem>>, vector<784x512xbf16>
    %cst = arith.constant dense<0.000000e+00> : vector<8x512xf32>
    %3 = tpu.matmul %1, %2, %cst {dimension_numbers = #tpu.dot_dimension_numbers<[1], [0], [0], [1], [0, 0, 1, 1], [], []>} : vector<8x784xbf16>, vector<784x512xbf16>, vector<8x512xf32> -> vector<8x512xf32>
    %c0_3 = arith.constant 0 : index
    %c0_4 = arith.constant 0 : index
    %4 = vector.load %arg3[%c0_3, %c0_4] : memref<1x512xf32, #tpu.memory_space<vmem>>, vector<1x512xf32>
    %5 = vector.broadcast %4 : vector<1x512xf32> to vector<8x512xf32>
    %6 = arith.addf %3, %5 : vector<8x512xf32>
    %cst_5 = arith.constant 0.000000e+00 : f32
    %7 = vector.broadcast %cst_5 : f32 to vector<8x512xf32>
    %8 = arith.maximumf %6, %7 : vector<8x512xf32>
    %9 = arith.truncf %8 : vector<8x512xf32> to vector<8x512xbf16>
    %c0_6 = arith.constant 0 : index
    %c0_7 = arith.constant 0 : index
    %10 = vector.load %arg4[%c0_6, %c0_7] : memref<512x256xbf16, #tpu.memory_space<vmem>>, vector<512x256xbf16>
    %cst_8 = arith.constant dense<0.000000e+00> : vector<8x256xf32>
    %11 = tpu.matmul %9, %10, %cst_8 {dimension_numbers = #tpu.dot_dimension_numbers<[1], [0], [0], [1], [0, 0, 1, 1], [], []>} : vector<8x512xbf16>, vector<512x256xbf16>, vector<8x256xf32> -> vector<8x256xf32>
    %c0_9 = arith.constant 0 : index
    %c0_10 = arith.constant 0 : index
    %12 = vector.load %arg5[%c0_9, %c0_10] : memref<1x256xf32, #tpu.memory_space<vmem>>, vector<1x256xf32>
    %13 = vector.broadcast %12 : vector<1x256xf32> to vector<8x256xf32>
    %14 = arith.addf %11, %13 : vector<8x256xf32>
    %cst_11 = arith.constant 0.000000e+00 : f32
    %15 = vector.broadcast %cst_11 : f32 to vector<8x256xf32>
    %16 = arith.maximumf %14, %15 : vector<8x256xf32>
    %17 = arith.truncf %16 : vector<8x256xf32> to vector<8x256xbf16>
    %c0_12 = arith.constant 0 : index
    %c0_13 = arith.constant 0 : index
    %18 = vector.load %arg6[%c0_12, %c0_13] : memref<256x128xbf16, #tpu.memory_space<vmem>>, vector<256x128xbf16>
    %cst_14 = arith.constant dense<0.000000e+00> : vector<8x128xf32>
    %19 = tpu.matmul %17, %18, %cst_14 {dimension_numbers = #tpu.dot_dimension_numbers<[1], [0], [0], [1], [0, 0, 1, 1], [], []>} : vector<8x256xbf16>, vector<256x128xbf16>, vector<8x128xf32> -> vector<8x128xf32>
    %c0_15 = arith.constant 0 : index
    %c0_16 = arith.constant 0 : index
    %20 = vector.load %arg7[%c0_15, %c0_16] : memref<1x128xf32, #tpu.memory_space<vmem>>, vector<1x128xf32>
    %21 = vector.broadcast %20 : vector<1x128xf32> to vector<8x128xf32>
    %22 = arith.addf %19, %21 : vector<8x128xf32>
    %cst_17 = arith.constant 0.000000e+00 : f32
    %23 = vector.broadcast %cst_17 : f32 to vector<8x128xf32>
    %24 = arith.maximumf %22, %23 : vector<8x128xf32>
    %25 = arith.truncf %24 : vector<8x128xf32> to vector<8x128xbf16>
    %c0_18 = arith.constant 0 : index
    %c0_19 = arith.constant 0 : index
    %26 = vector.load %arg8[%c0_18, %c0_19] : memref<128x128xbf16, #tpu.memory_space<vmem>>, vector<128x128xbf16>
    %cst_20 = arith.constant dense<0.000000e+00> : vector<8x128xf32>
    %27 = tpu.matmul %25, %26, %cst_20 {dimension_numbers = #tpu.dot_dimension_numbers<[1], [0], [0], [1], [0, 0, 1, 1], [], []>} : vector<8x128xbf16>, vector<128x128xbf16>, vector<8x128xf32> -> vector<8x128xf32>
    %c0_21 = arith.constant 0 : index
    %c0_22 = arith.constant 0 : index
    %28 = vector.load %arg9[%c0_21, %c0_22] : memref<1x128xf32, #tpu.memory_space<vmem>>, vector<1x128xf32>
    %29 = vector.broadcast %28 : vector<1x128xf32> to vector<8x128xf32>
    %30 = arith.addf %27, %29 : vector<8x128xf32>
    %cst_23 = arith.constant dense<0xFF800000> : vector<8xf32>
    %31 = vector.multi_reduction <maximumf>, %30, %cst_23 [1] : vector<8x128xf32> to vector<8xf32>
    %32 = vector.shape_cast %31 : vector<8xf32> to vector<8x1xf32>
    %33 = vector.broadcast %32 : vector<8x1xf32> to vector<8x128xf32>
    %34 = arith.subf %30, %33 : vector<8x128xf32>
    %35 = math.exp %34 : vector<8x128xf32>
    %cst_24 = arith.constant dense<0.000000e+00> : vector<8xf32>
    %36 = vector.multi_reduction <add>, %35, %cst_24 [1] : vector<8x128xf32> to vector<8xf32>
    %37 = vector.shape_cast %36 : vector<8xf32> to vector<8x1xf32>
    %38 = vector.broadcast %37 : vector<8x1xf32> to vector<8x128xf32>
    %39 = arith.divf %35, %38 : vector<8x128xf32>
    %c0_25 = arith.constant 0 : index
    %c0_26 = arith.constant 0 : index
    %40 = vector.load %arg10[%c0_25, %c0_26] : memref<8x128xf32, #tpu.memory_space<vmem>>, vector<8x128xf32>
    tpu.vector_store %arg10[%c0_25, %c0_26], %39 {strides = array<i32>} : memref<8x128xf32, #tpu.memory_space<vmem>>, vector<8x128xf32>,
    return
  }
  func.func @transform_0(%arg0: i32) -> (i32, i32) {
    %c0_i32 = arith.constant 0 : i32
    %c0_i32_0 = arith.constant 0 : i32
    return %arg0, %c0_i32 : i32, i32
  }
  func.func @transform_1(%arg0: i32) -> (i32, i32) {
    %c0_i32 = arith.constant 0 : i32
    %c0_i32_0 = arith.constant 0 : i32
    %c0_i32_1 = arith.constant 0 : i32
    return %c0_i32, %c0_i32_0 : i32, i32
  }
  func.func @transform_2(%arg0: i32) -> (i32, i32) {
    %c0_i32 = arith.constant 0 : i32
    %c0_i32_0 = arith.constant 0 : i32
    %c0_i32_1 = arith.constant 0 : i32
    return %c0_i32, %c0_i32_0 : i32, i32
  }
  func.func @transform_3(%arg0: i32) -> (i32, i32) {
    %c0_i32 = arith.constant 0 : i32
    %c0_i32_0 = arith.constant 0 : i32
    %c0_i32_1 = arith.constant 0 : i32
    return %c0_i32, %c0_i32_0 : i32, i32
  }
  func.func @transform_4(%arg0: i32) -> (i32, i32) {
    %c0_i32 = arith.constant 0 : i32
    %c0_i32_0 = arith.constant 0 : i32
    %c0_i32_1 = arith.constant 0 : i32
    return %c0_i32, %c0_i32_0 : i32, i32
  }
  func.func @transform_5(%arg0: i32) -> (i32, i32) {
    %c0_i32 = arith.constant 0 : i32
    %c0_i32_0 = arith.constant 0 : i32
    %c0_i32_1 = arith.constant 0 : i32
    return %c0_i32, %c0_i32_0 : i32, i32
  }
  func.func @transform_6(%arg0: i32) -> (i32, i32) {
    %c0_i32 = arith.constant 0 : i32
    %c0_i32_0 = arith.constant 0 : i32
    %c0_i32_1 = arith.constant 0 : i32
    return %c0_i32, %c0_i32_0 : i32, i32
  }
  func.func @transform_7(%arg0: i32) -> (i32, i32) {
    %c0_i32 = arith.constant 0 : i32
    %c0_i32_0 = arith.constant 0 : i32
    %c0_i32_1 = arith.constant 0 : i32
    return %c0_i32, %c0_i32_0 : i32, i32
  }
  func.func @transform_8(%arg0: i32) -> (i32, i32) {
    %c0_i32 = arith.constant 0 : i32
    %c0_i32_0 = arith.constant 0 : i32
    %c0_i32_1 = arith.constant 0 : i32
    return %c0_i32, %c0_i32_0 : i32, i32
  }
  func.func @transform_9(%arg0: i32) -> (i32, i32) {
    %c0_i32 = arith.constant 0 : i32
    %c0_i32_0 = arith.constant 0 : i32
    return %arg0, %c0_i32 : i32, i32
  }
}

</mosaic_0001>

<bundles_post_ra>
// kernel: fc_forward.1
= control target key start
LH: loop header
LB: loop body
LE: loop exit
PB: predicated region body
PF: predicated region fallthrough
CT: control target
= control target key end

     0   :  { %14 = vsyncpa [#allocation3], 0  ;;  %s3428_s0 = inlined_call_operand.vmem [shape: f32[8,784], index: 0, kind: input, shape index: {}]   ;;  %s3429_s1 = inlined_call_operand.hbm [shape: bf16[784,512], index: 1, kind: input, shape index: {}]   ;;  %s3430_s2 = inlined_call_operand.vmem [shape: f32[1,512], index: 2, kind: input, shape index: {}]   ;;  %s3431_s3 = inlined_call_operand.hbm [shape: bf16[512,256], index: 3, kind: input, shape index: {}]   ;;  %s3432_s4 = inlined_call_operand.vmem [shape: f32[1,256], index: 4, kind: input, shape index: {}]   ;;  %s3433_s5 = inlined_call_operand.vmem [shape: bf16[256,128], index: 5, kind: input, shape index: {}]   ;;  %s3434_s6 = inlined_call_operand.vmem [shape: f32[1,128], index: 6, kind: input, shape index: {}]   ;;  %s3435_s7 = inlined_call_operand.vmem [shape: bf16[128,128], index: 7, kind: input, shape index: {}]   ;;  %s3436_s8 = inlined_call_operand.vmem [shape: f32[1,128], index: 8, kind: input, shape index: {}]   ;;  %s3437_s9 = inlined_call_operand.vmem [shape: f32[8,128], index: 9, kind: output, shape index: {}]  }
   0x1   :  { %15 = vsyncpa [#allocation5], 0  ;;  %s3209_s30 = smov [#allocation2]  }
   0x2   :  { %s23_s10 = sshll.u32 %s3209_s30, 4  ;;  %s24_s10 = int_to_ptr.vmem [resolvable:$true] %s23_s10 }
   0x3   :  { %s3173_s11 = scalar_lea.vmem %s24_s10, 25088  ;;  %p3178_p1 = scmp.lt.s32.totalorder %s24_s10, %s24_s10 }
   0x4   :  { %p3174_p0 = scmp.ne.s32.totalorder %s24_s10, %s3173_s11  ;;  %p3179_p2 = scmp.lt.s32.totalorder %s3173_s11, %s3173_s11 }
   0x6   :  { %p3180_p3 = por %p3179_p2, %p3178_p1 }
   0x8   :  { %p3181_p4 = pnand %p3180_p3, %p3174_p0 }
   0xa   :  { %3184 = shalt.err (!%p3181_p4)
}
   0xb   :  { %s3210_s12 = smov 256   ;;  %s3211_s13 = smov 16  }
   0xc   :  { %29 = dma.hbm_to_vmem [thread:$0]  %s3429_s1, 25088, %s24_s10, [#allocation3], %s3210_s12, %s3210_s12, %s3211_s13  }
   0xd   :  { %s3212_s16 = smov [#allocation4]  }
   0xe   :  { %s37_s17 = sshll.u32 %s3212_s16, 4  ;;  %s38_s17 = int_to_ptr.vmem [resolvable:$true] %s37_s17 }
   0xf   :  { %s3193_s18 = scalar_lea.vmem %s38_s17, 8192  ;;  %p3198_p6 = scmp.lt.s32.totalorder %s38_s17, %s38_s17 }
  0x10   :  { %p3194_p5 = scmp.ne.s32.totalorder %s38_s17, %s3193_s18  ;;  %p3199_p7 = scmp.lt.s32.totalorder %s3193_s18, %s3193_s18 }
  0x12   :  { %p3200_p8 = por %p3199_p7, %p3198_p6 }
  0x14   :  { %p3201_p9 = pnand %p3200_p8, %p3194_p5 }
  0x16   :  { %3204 = shalt.err (!%p3201_p9)
}
  0x17   :  { %s3213_s19 = smov 128   ;;  %s3214_s20 = smov 8  }
  0x18   :  { %43 = dma.hbm_to_vmem [thread:$0]  %s3431_s3, 8192, %s38_s17, [#allocation5], %s3213_s19, %s3213_s19, %s3214_s20  }
  0x19   :  { %3205 = dma.done.wait [#allocation3], 25088  }
  0x1a   :  { %3206 = vsyncadd [#allocation3], 4294942208 }
  0x1b   :  { %3207 = dma.done.wait [#allocation5], 8192  }
  0x1c   :  { %3208 = vsyncadd [#allocation5], 4294959104  ;;  %v2747_v0 = vld [vmem:[#allocation2 + $0xe4] ss:$16 sps:$4 sm:$0xff]   ;;  %v2751_v2 = vld [vmem:[#allocation2 + $0xe0] ss:$16 sps:$4 sm:$0xff]  }
  0x1d   :  { %v2749_v1 = vld [vmem:[#allocation2 + $0x2e4] ss:$16 sps:$4 sm:$0xff]   ;;  %1277 = vmatprep.subr.bf16.mxu0 %v2747_v0  ;;  %v2752_v3 = vld [vmem:[#allocation2 + $0x2e0] ss:$16 sps:$4 sm:$0xff]   ;;  %v62_v46 = vld [vmem:[%s3428_s0 + $0x8] sm:$0xff]  ;;  %vm1273_vm0 = vcmask 130048  }
  0x1e   :  { %1318 = vmatprep.subr.bf16.mxu1 %v2749_v1  ;;  %v2753_v4 = vld [vmem:[#allocation2 + $0xc4] ss:$16 sps:$4 sm:$0xff]   ;;  %1278 = vmatpush1.bf16.msra.mxu0 %v2751_v2  ;;  %v2757_v6 = vld [vmem:[#allocation2 + $0xc0] ss:$16 sps:$4 sm:$0xff]   ;;  %v3277_v49 = vpack.c.bf16 %v62_v46, %v62_v46  ;;  %v64_v50 = vld [vmem:[%s3428_s0 + $0x18] sm:$0xff]  ;;  %vm3217_vm1 = vmmov 0  }
  0x1f   :  { %1319 = vmatpush1.bf16.msra.mxu1 %v2752_v3  ;;  %v2755_v5 = vld [vmem:[#allocation2 + $0x2c4] ss:$16 sps:$4 sm:$0xff]   ;;  %1279 = vmatprep.subr.bf16.mxu0 %v2753_v4  ;;  %v2758_v7 = vld [vmem:[#allocation2 + $0x2c0] ss:$16 sps:$4 sm:$0xff]   ;;  %v3282_v52 = vpack.c.bf16 %v64_v50, %v64_v50 }
  0x20   :  { %1320 = vmatprep.subr.bf16.mxu1 %v2755_v5  ;;  %v2759_v8 = vld [vmem:[#allocation2 + $0xa4] ss:$16 sps:$4 sm:$0xff]   ;;  %v2763_v10 = vld [vmem:[#allocation2 + $0xa0] ss:$16 sps:$4 sm:$0xff]   ;;  %1309 = vmatprep.mubr.bf16.mxu0 %v3277_v49 }
  0x21   :  { %v2761_v9 = vld [vmem:[#allocation2 + $0x2a4] ss:$16 sps:$4 sm:$0xff]   ;;  %v2764_v11 = vld [vmem:[#allocation2 + $0x2a0] ss:$16 sps:$4 sm:$0xff]   ;;  %1350 = vmatprep.mubr.bf16.mxu1 %v3282_v52 }
  0x22   :  { %1280 = vmatpush1.bf16.msra.mxu0 %v2757_v6  ;;  %v2765_v12 = vld [vmem:[#allocation2 + $0x84] ss:$16 sps:$4 sm:$0xff]   ;;  %v2769_v14 = vld [vmem:[#allocation2 + $0x80] ss:$16 sps:$4 sm:$0xff]  }
  0x23   :  { %1321 = vmatpush1.bf16.msra.mxu1 %v2758_v7  ;;  %1281 = vmatprep.subr.bf16.mxu0 %v2759_v8  ;;  %v2767_v13 = vld [vmem:[#allocation2 + $0x284] ss:$16 sps:$4 sm:$0xff]   ;;  %v2770_v15 = vld [vmem:[#allocation2 + $0x280] ss:$16 sps:$4 sm:$0xff]  }
  0x24   :  { %1322 = vmatprep.subr.bf16.mxu1 %v2761_v9  ;;  %v2771_v16 = vld [vmem:[#allocation2 + $0x64] ss:$16 sps:$4 sm:$0xff]   ;;  %v2775_v18 = vld [vmem:[#allocation2 + $0x60] ss:$16 sps:$4 sm:$0xff]  }
  0x25   :  { %v2773_v17 = vld [vmem:[#allocation2 + $0x264] ss:$16 sps:$4 sm:$0xff]   ;;  %v2776_v19 = vld [vmem:[#allocation2 + $0x260] ss:$16 sps:$4 sm:$0xff]  }
  0x26   :  { %1282 = vmatpush1.bf16.msra.mxu0 %v2763_v10  ;;  %v2777_v20 = vld [vmem:[#allocation2 + $0x44] ss:$16 sps:$4 sm:$0xff]   ;;  %v2781_v22 = vld [vmem:[#allocation2 + $0x40] ss:$16 sps:$4 sm:$0xff]  }
  0x27   :  { %1323 = vmatpush1.bf16.msra.mxu1 %v2764_v11  ;;  %1283 = vmatprep.subr.bf16.mxu0 %v2765_v12  ;;  %v2779_v21 = vld [vmem:[#allocation2 + $0x244] ss:$16 sps:$4 sm:$0xff]   ;;  %v2782_v23 = vld [vmem:[#allocation2 + $0x240] ss:$16 sps:$4 sm:$0xff]  }
  0x28   :  { %1324 = vmatprep.subr.bf16.mxu1 %v2767_v13  ;;  %v2783_v24 = vld [vmem:[#allocation2 + $0x24] ss:$16 sps:$4 sm:$0xff]   ;;  %v2787_v26 = vld [vmem:[#allocation2 + $0x20] ss:$16 sps:$4 sm:$0xff]   ;;  %v2854_v13 = vld [vmem:[#allocation2 + $0xec] ss:$16 sps:$4 sm:$0xff]  }
  0x29   :  { %v2785_v25 = vld [vmem:[#allocation2 + $0x224] ss:$16 sps:$4 sm:$0xff]   ;;  %v2788_v27 = vld [vmem:[#allocation2 + $0x220] ss:$16 sps:$4 sm:$0xff]  }
  0x2a   :  { %1284 = vmatpush1.bf16.msra.mxu0 %v2769_v14  ;;  %v2789_v28 = vld [vmem:[#allocation2 + $0x4] ss:$16 sps:$4 sm:$0xff]   ;;  %v2793_v30 = vld [vmem:[#allocation2] ss:$16 sps:$4 sm:$0xff]  }
  0x2b   :  { %1325 = vmatpush1.bf16.msra.mxu1 %v2770_v15  ;;  %1285 = vmatprep.subr.bf16.mxu0 %v2771_v16  ;;  %v2791_v29 = vld [vmem:[#allocation2 + $0x204] ss:$16 sps:$4 sm:$0xff]   ;;  %v2794_v31 = vld [vmem:[#allocation2 + $0x200] ss:$16 sps:$4 sm:$0xff]   ;;  %v3215_v16 = vmov 0  }
  0x2c   :  { %1326 = vmatprep.subr.bf16.mxu1 %v2773_v17  ;;  %v2795_v32 = vld [vmem:[#allocation2 + $0x1e4] ss:$16 sps:$4 sm:$0xff]   ;;  %v2799_v34 = vld [vmem:[#allocation2 + $0x1e0] ss:$16 sps:$4 sm:$0xff]  }
  0x2d   :  { %v2797_v33 = vld [vmem:[#allocation2 + $0x3e4] ss:$16 sps:$4 sm:$0xff]   ;;  %v2800_v35 = vld [vmem:[#allocation2 + $0x3e0] ss:$16 sps:$4 sm:$0xff]  }
  0x2e   :  { %1286 = vmatpush1.bf16.msra.mxu0 %v2775_v18  ;;  %v2801_v36 = vld [vmem:[#allocation2 + $0x1c4] ss:$16 sps:$4 sm:$0xff]   ;;  %v2805_v38 = vld [vmem:[#allocation2 + $0x1c0] ss:$16 sps:$4 sm:$0xff]   ;;  %v2852_v18 = vld [vmem:[#allocation2 + $0xe8] ss:$16 sps:$4 sm:$0xff]  }
  0x2f   :  { %1327 = vmatpush1.bf16.msra.mxu1 %v2776_v19  ;;  %1287 = vmatprep.subr.bf16.mxu0 %v2777_v20  ;;  %v2803_v37 = vld [vmem:[#allocation2 + $0x3c4] ss:$16 sps:$4 sm:$0xff]   ;;  %v2806_v39 = vld [vmem:[#allocation2 + $0x3c0] ss:$16 sps:$4 sm:$0xff]  }
  0x30   :  { %1328 = vmatprep.subr.bf16.mxu1 %v2779_v21  ;;  %v2807_v40 = vld [vmem:[#allocation2 + $0x1a4] ss:$16 sps:$4 sm:$0xff]   ;;  %v2811_v42 = vld [vmem:[#allocation2 + $0x1a0] ss:$16 sps:$4 sm:$0xff]   ;;  %v2860_v21 = vld [vmem:[#allocation2 + $0xcc] ss:$16 sps:$4 sm:$0xff]  }
  0x31   :  { %v2809_v41 = vld [vmem:[#allocation2 + $0x3a4] ss:$16 sps:$4 sm:$0xff]   ;;  %v2812_v43 = vld [vmem:[#allocation2 + $0x3a0] ss:$16 sps:$4 sm:$0xff]  }
  0x32   :  { %1288 = vmatpush1.bf16.msra.mxu0 %v2781_v22  ;;  %v2813_v44 = vld [vmem:[#allocation2 + $0x184] ss:$16 sps:$4 sm:$0xff]   ;;  %v2817_v47 = vld [vmem:[#allocation2 + $0x180] ss:$16 sps:$4 sm:$0xff]  }
  0x33   :  { %1329 = vmatpush1.bf16.msra.mxu1 %v2782_v23  ;;  %1289 = vmatprep.subr.bf16.mxu0 %v2783_v24  ;;  %v2815_v45 = vld [vmem:[#allocation2 + $0x384] ss:$16 sps:$4 sm:$0xff]   ;;  %v2818_v48 = vld [vmem:[#allocation2 + $0x380] ss:$16 sps:$4 sm:$0xff]   ;;  %v2858_v23 = vld [vmem:[#allocation2 + $0xc8] ss:$16 sps:$4 sm:$0xff]  }
  0x34   :  { %1330 = vmatprep.subr.bf16.mxu1 %v2785_v25  ;;  %v2819_v51 = vld [vmem:[#allocation2 + $0x164] ss:$16 sps:$4 sm:$0xff]   ;;  %v2823_v54 = vld [vmem:[#allocation2 + $0x160] ss:$16 sps:$4 sm:$0xff]   ;;  %v2866_v25 = vld [vmem:[#allocation2 + $0xac] ss:$16 sps:$4 sm:$0xff]  }
  0x35   :  { %v2821_v53 = vld [vmem:[#allocation2 + $0x364] ss:$16 sps:$4 sm:$0xff]   ;;  %v2824_v55 = vld [vmem:[#allocation2 + $0x360] ss:$16 sps:$4 sm:$0xff]  }
  0x36   :  { %1290 = vmatpush1.bf16.msra.mxu0 %v2787_v26  ;;  %v2825_v56 = vld [vmem:[#allocation2 + $0x144] ss:$16 sps:$4 sm:$0xff]   ;;  %v2829_v58 = vld [vmem:[#allocation2 + $0x140] ss:$16 sps:$4 sm:$0xff]  }
  0x37   :  { %1331 = vmatpush1.bf16.msra.mxu1 %v2788_v27  ;;  %1291 = vmatprep.subr.bf16.mxu0 %v2789_v28  ;;  %v2827_v57 = vld [vmem:[#allocation2 + $0x344] ss:$16 sps:$4 sm:$0xff]   ;;  %v2830_v59 = vld [vmem:[#allocation2 + $0x340] ss:$16 sps:$4 sm:$0xff]   ;;  %v2864_v27 = vld [vmem:[#allocation2 + $0xa8] ss:$16 sps:$4 sm:$0xff]  }
  0x38   :  { %1332 = vmatprep.subr.bf16.mxu1 %v2791_v29  ;;  %v2831_v60 = vld [vmem:[#allocation2 + $0x124] ss:$16 sps:$4 sm:$0xff]   ;;  %v2835_v62 = vld [vmem:[#allocation2 + $0x120] ss:$16 sps:$4 sm:$0xff]   ;;  %v2872_v29 = vld [vmem:[#allocation2 + $0x8c] ss:$16 sps:$4 sm:$0xff]  }
  0x39   :  { %v2833_v61 = vld [vmem:[#allocation2 + $0x324] ss:$16 sps:$4 sm:$0xff]   ;;  %v2836_v63 = vld [vmem:[#allocation2 + $0x320] ss:$16 sps:$4 sm:$0xff]  }
  0x3a   :  { %1292 = vmatpush1.bf16.msra.mxu0 %v2793_v30  ;;  %v2837_v0 = vld [vmem:[#allocation2 + $0x104] ss:$16 sps:$4 sm:$0xff]   ;;  %v2841_v2 = vld [vmem:[#allocation2 + $0x100] ss:$16 sps:$4 sm:$0xff]  }
  0x3b   :  { %1333 = vmatpush1.bf16.msra.mxu1 %v2794_v31  ;;  %1293 = vmatprep.subr.bf16.mxu0 %v2795_v32  ;;  %v2839_v1 = vld [vmem:[#allocation2 + $0x304] ss:$16 sps:$4 sm:$0xff]   ;;  %v2842_v3 = vld [vmem:[#allocation2 + $0x300] ss:$16 sps:$4 sm:$0xff]   ;;  %v2870_v31 = vld [vmem:[#allocation2 + $0x88] ss:$16 sps:$4 sm:$0xff]  }
  0x3c   :  { %1334 = vmatprep.subr.bf16.mxu1 %v2797_v33  ;;  %v61_v4 = vld [vmem:[%s3428_s0] sm:$0xff]  ;;  %v63_v5 = vld [vmem:[%s3428_s0 + $0x10] sm:$0xff]  ;;  %v2878_v33 = vld [vmem:[#allocation2 + $0x6c] ss:$16 sps:$4 sm:$0xff]  }
  0x3d   :  { %v2845_v6 = vld [vmem:[#allocation2 + $0x4e4] ss:$16 sps:$4 sm:$0xff]   ;;  %v3292_v8 = vpack.c.bf16 %v61_v4, %v61_v4  ;;  %v3294_v9 = vpack.c.bf16 %v63_v5, %v63_v5  ;;  %v2843_v10 = vld [vmem:[#allocation2 + $0x4e0] ss:$16 sps:$4 sm:$0xff]   ;;  %v2926_v4 = vld [vmem:[#allocation2 + $0x16c] ss:$16 sps:$4 sm:$0xff]  }
  0x3e   :  { %1294 = vmatpush2.bf16.msra.mxu0 %v2799_v34  ;;  %v2848_v7 = vld [vmem:[#allocation2 + $0x604] ss:$16 sps:$4 sm:$0xff]   ;;  %v2846_v11 = vld [vmem:[#allocation2 + $0x600] ss:$16 sps:$4 sm:$0xff]  }
  0x3f   :  { %1335 = vmatpush2.bf16.msra.mxu1 %v2800_v35  ;;  %1295 = vmatprep.subr.bf16.mxu0 %v2801_v36  ;;  %v2851_v12 = vld [vmem:[#allocation2 + $0x4c4] ss:$16 sps:$4 sm:$0xff]   ;;  %v2849_v14 = vld [vmem:[#allocation2 + $0x4c0] ss:$16 sps:$4 sm:$0xff]   ;;  %v66_v35 = vld [vmem:[%s3428_s0 + $0x28] sm:$0xff] }
  0x40   :  { %1336 = vmatprep.subr.bf16.mxu1 %v2803_v37  ;;  %v67_v15 = vld [vmem:[%s3428_s0 + $0x30] sm:$0xff]  ;;  %v3310_v36 = vpack.c.bf16 %v66_v35, %v66_v35  ;;  %v2876_v37 = vld [vmem:[#allocation2 + $0x68] ss:$16 sps:$4 sm:$0xff]   ;;  %v2965_v35 = vld [vmem:[#allocation2 + $0x26c] ss:$16 sps:$4 sm:$0xff]  }
  0x41   :  { %v2857_v17 = vld [vmem:[#allocation2 + $0x4a4] ss:$16 sps:$4 sm:$0xff]   ;;  %v3302_v19 = vpack.c.bf16 %v67_v15, %v67_v15  ;;  %v2855_v20 = vld [vmem:[#allocation2 + $0x4a0] ss:$16 sps:$4 sm:$0xff]  }
  0x42   :  { %1296 = vmatpush2.bf16.msra.mxu0 %v2805_v38  ;;  %v2863_v22 = vld [vmem:[#allocation2 + $0x484] ss:$16 sps:$4 sm:$0xff]   ;;  %v2861_v24 = vld [vmem:[#allocation2 + $0x480] ss:$16 sps:$4 sm:$0xff]  }
  0x43   :  { %1337 = vmatpush2.bf16.msra.mxu1 %v2806_v39  ;;  %1297 = vmatprep.subr.bf16.mxu0 %v2807_v40  ;;  %v2869_v26 = vld [vmem:[#allocation2 + $0x464] ss:$16 sps:$4 sm:$0xff]   ;;  %v2867_v28 = vld [vmem:[#allocation2 + $0x460] ss:$16 sps:$4 sm:$0xff]   ;;  %v2884_v39 = vld [vmem:[#allocation2 + $0x4c] ss:$16 sps:$4 sm:$0xff]  }
  0x44   :  { %1338 = vmatprep.subr.bf16.mxu1 %v2809_v41  ;;  %v2875_v30 = vld [vmem:[#allocation2 + $0x444] ss:$16 sps:$4 sm:$0xff]   ;;  %v2873_v32 = vld [vmem:[#allocation2 + $0x440] ss:$16 sps:$4 sm:$0xff]   ;;  %v2882_v41 = vld [vmem:[#allocation2 + $0x48] ss:$16 sps:$4 sm:$0xff]  }
  0x45   :  { %v2881_v34 = vld [vmem:[#allocation2 + $0x424] ss:$16 sps:$4 sm:$0xff]   ;;  %v2879_v38 = vld [vmem:[#allocation2 + $0x420] ss:$16 sps:$4 sm:$0xff]  }
  0x46   :  { %1298 = vmatpush2.bf16.msra.mxu0 %v2811_v42  ;;  %v2887_v40 = vld [vmem:[#allocation2 + $0x404] ss:$16 sps:$4 sm:$0xff]   ;;  %v2885_v42 = vld [vmem:[#allocation2 + $0x400] ss:$16 sps:$4 sm:$0xff]  }
  0x47   :  { %1339 = vmatpush2.bf16.msra.mxu1 %v2812_v43  ;;  %1299 = vmatprep.subr.bf16.mxu0 %v2813_v44  ;;  %v2890_v43 = vld [vmem:[#allocation2 + $0x2c] ss:$16 sps:$4 sm:$0xff]   ;;  %v2893_v44 = vld [vmem:[#allocation2 + $0x5e4] ss:$16 sps:$4 sm:$0xff]   ;;  %v2891_v46 = vld [vmem:[#allocation2 + $0x5e0] ss:$16 sps:$4 sm:$0xff]  }
  0x48   :  { %1340 = vmatprep.subr.bf16.mxu1 %v2815_v45  ;;  %v2888_v45 = vld [vmem:[#allocation2 + $0x28] ss:$16 sps:$4 sm:$0xff]   ;;  %v2897_v50 = vld [vmem:[#allocation2 + $0x5c0] ss:$16 sps:$4 sm:$0xff]   ;;  %v2929_v5 = vld [vmem:[#allocation2 + $0x524] ss:$16 sps:$4 sm:$0xff]  }
  0x49   :  { %v65_v15 = vld [vmem:[%s3428_s0 + $0x20] sm:$0xff] }
  0x4a   :  { %1300 = vmatpush2.bf16.msra.mxu0 %v2817_v47  ;;  %v2896_v47 = vld [vmem:[#allocation2 + $0xc] ss:$16 sps:$4 sm:$0xff]  }
  0x4b   :  { %1341 = vmatpush2.bf16.msra.mxu1 %v2818_v48  ;;  %1301 = vmatprep.subr.bf16.mxu0 %v2819_v51  ;;  %v2899_v48 = vld [vmem:[#allocation2 + $0x5c4] ss:$16 sps:$4 sm:$0xff]   ;;  %v2902_v51 = vld [vmem:[#allocation2 + $0x1ec] ss:$16 sps:$4 sm:$0xff]  }
  0x4c   :  { %1342 = vmatprep.subr.bf16.mxu1 %v2821_v53  ;;  %v2905_v53 = vld [vmem:[#allocation2 + $0x5a4] ss:$16 sps:$4 sm:$0xff]  }
  0x4e   :  { %1302 = vmatpush2.bf16.msra.mxu0 %v2823_v54  ;;  %v2900_v54 = vld [vmem:[#allocation2 + $0x1e8] ss:$16 sps:$4 sm:$0xff]  }
  0x4f   :  { %1343 = vmatpush2.bf16.msra.mxu1 %v2824_v55  ;;  %1303 = vmatprep.subr.bf16.mxu0 %v2825_v56  ;;  %v2903_v55 = vld [vmem:[#allocation2 + $0x5a0] ss:$16 sps:$4 sm:$0xff]   ;;  %v2908_v56 = vld [vmem:[#allocation2 + $0x1cc] ss:$16 sps:$4 sm:$0xff]  }
  0x50   :  { %1344 = vmatprep.subr.bf16.mxu1 %v2827_v57  ;;  %v2911_v57 = vld [vmem:[#allocation2 + $0x584] ss:$16 sps:$4 sm:$0xff]  }
  0x52   :  { %1304 = vmatpush2.bf16.msra.mxu0 %v2829_v58  ;;  %v2906_v58 = vld [vmem:[#allocation2 + $0x1c8] ss:$16 sps:$4 sm:$0xff]  }
  0x53   :  { %1345 = vmatpush2.bf16.msra.mxu1 %v2830_v59  ;;  %1305 = vmatprep.subr.bf16.mxu0 %v2831_v60  ;;  %v2909_v59 = vld [vmem:[#allocation2 + $0x580] ss:$16 sps:$4 sm:$0xff]   ;;  %v2914_v60 = vld [vmem:[#allocation2 + $0x1ac] ss:$16 sps:$4 sm:$0xff]  }
  0x54   :  { %1346 = vmatprep.subr.bf16.mxu1 %v2833_v61  ;;  %v2917_v61 = vld [vmem:[#allocation2 + $0x564] ss:$16 sps:$4 sm:$0xff]  }
  0x56   :  { %1306 = vmatpush2.bf16.msra.mxu0 %v2835_v62  ;;  %v2912_v62 = vld [vmem:[#allocation2 + $0x1a8] ss:$16 sps:$4 sm:$0xff]  }
  0x57   :  { %1347 = vmatpush2.bf16.msra.mxu1 %v2836_v63  ;;  %1307 = vmatprep.subr.bf16.mxu0 %v2837_v0  ;;  %v2915_v63 = vld [vmem:[#allocation2 + $0x560] ss:$16 sps:$4 sm:$0xff]   ;;  %v2920_v0 = vld [vmem:[#allocation2 + $0x18c] ss:$16 sps:$4 sm:$0xff]  }
  0x58   :  { %1348 = vmatprep.subr.bf16.mxu1 %v2839_v1  ;;  %v2923_v1 = vld [vmem:[#allocation2 + $0x544] ss:$16 sps:$4 sm:$0xff]  }
  0x5a   :  { %1308 = vmatpush2.bf16.msra.mxu0 %v2841_v2  ;;  %v2918_v2 = vld [vmem:[#allocation2 + $0x188] ss:$16 sps:$4 sm:$0xff]  }
  0x5b   :  { %1349 = vmatpush2.bf16.msra.mxu1 %v2842_v3  ;;  %1359 = vmatprep.subr.bf16.mxu0 %v2845_v6  ;;  %v2921_v3 = vld [vmem:[#allocation2 + $0x540] ss:$16 sps:$4 sm:$0xff]   ;;  %v2924_v6 = vld [vmem:[#allocation2 + $0x168] ss:$16 sps:$4 sm:$0xff]  }
  0x5c   :  { %1414 = vmatprep.subr.bf16.mxu1 %v2848_v7  ;;  %v2927_v7 = vld [vmem:[#allocation2 + $0x520] ss:$16 sps:$4 sm:$0xff]  }
  0x5d   :  { %1310 = vmatmul.mubr.bf16.vlgmr.msra.gmra.mxu0 %v3292_v8 }
  0x5e   :  { %1351 = vmatmul.mubr.bf16.vlgmr.msra.gmra.mxu1 %v3294_v9  ;;  %1360 = vmatpush1.bf16.msra.mxu0 %v2843_v10  ;;  %v2932_v10 = vld [vmem:[#allocation2 + $0x14c] ss:$16 sps:$4 sm:$0xff]  }
  0x5f   :  { %1415 = vmatpush1.bf16.msra.mxu1 %v2846_v11  ;;  %1361 = vmatprep.subr.bf16.mxu0 %v2851_v12  ;;  %v2935_v11 = vld [vmem:[#allocation2 + $0x504] ss:$16 sps:$4 sm:$0xff]   ;;  %v2930_v12 = vld [vmem:[#allocation2 + $0x148] ss:$16 sps:$4 sm:$0xff]  }
  0x60   :  { %1432 = vmatprep.mubr.bf16.mxu1 %v3215_v16  ;;  %1441 = vmatprep.subr.bf16.mxu1 %v2854_v13  ;;  %v2933_v13 = vld [vmem:[#allocation2 + $0x500] ss:$16 sps:$4 sm:$0xff]  }
  0x61   :  { %1391 = vmatprep.mubr.bf16.mxu0 %v3310_v36 }
  0x62   :  { %1362 = vmatpush1.bf16.msra.mxu0 %v2849_v14  ;;  %v2938_v14 = vld [vmem:[#allocation2 + $0x12c] ss:$16 sps:$4 sm:$0xff]  }
  0x63   :  { %1363 = vmatprep.subr.bf16.mxu0 %v2857_v17  ;;  %v2941_v17 = vld [vmem:[#allocation2 + $0x2ec] ss:$16 sps:$4 sm:$0xff]  }
  0x66   :  { %2595 = vmatmul.mubr.msk.bf16.vlgmr.msra.gmra.mxu1 %vm1273_vm0, %v3302_v19  ;;  %1364 = vmatpush1.bf16.msra.mxu0 %v2855_v20  ;;  %v3316_v20 = vpack.c.bf16 %v65_v15, %v65_v15  ;;  %v3028_v15 = vld [vmem:[#allocation2 + $0x54c] ss:$16 sps:$4 sm:$0xff]  }
  0x67   :  { %1442 = vmatpush1.bf16.msra.mxu1 %v2852_v18  ;;  %1365 = vmatprep.subr.bf16.mxu0 %v2863_v22  ;;  %v2936_v18 = vld [vmem:[#allocation2 + $0x128] ss:$16 sps:$4 sm:$0xff]   ;;  %v2944_v22 = vld [vmem:[#allocation2 + $0x10c] ss:$16 sps:$4 sm:$0xff]  }
  0x68   :  { %1443 = vmatprep.subr.bf16.mxu1 %v2860_v21  ;;  %1473 = vmatprep.mubr.bf16.mxu1 %v3277_v49  ;;  %v2894_v49 = vld [vmem:[#allocation2 + $0x8] ss:$16 sps:$4 sm:$0xff]  }
  0x69   :  { %v2939_v21 = vld [vmem:[#allocation2 + $0x2e8] ss:$16 sps:$4 sm:$0xff]  }
  0x6a   :  { %1366 = vmatpush1.bf16.msra.mxu0 %v2861_v24  ;;  %v2942_v24 = vld [vmem:[#allocation2 + $0x108] ss:$16 sps:$4 sm:$0xff]  }
  0x6b   :  { %1444 = vmatpush1.bf16.msra.mxu1 %v2858_v23  ;;  %1367 = vmatprep.subr.bf16.mxu0 %v2869_v26  ;;  %v2947_v23 = vld [vmem:[#allocation2 + $0x2cc] ss:$16 sps:$4 sm:$0xff]  }
  0x6c   :  { %1445 = vmatprep.subr.bf16.mxu1 %v2866_v25  ;;  %v2945_v25 = vld [vmem:[#allocation2 + $0x2c8] ss:$16 sps:$4 sm:$0xff]   ;;  %v2950_v26 = vld [vmem:[#allocation2 + $0x4ec] ss:$16 sps:$4 sm:$0xff]  }
  0x6e   :  { %1368 = vmatpush1.bf16.msra.mxu0 %v2867_v28  ;;  %v2948_v28 = vld [vmem:[#allocation2 + $0x4e8] ss:$16 sps:$4 sm:$0xff]  }
  0x6f   :  { %1446 = vmatpush1.bf16.msra.mxu1 %v2864_v27  ;;  %1369 = vmatprep.subr.bf16.mxu0 %v2875_v30  ;;  %v2953_v27 = vld [vmem:[#allocation2 + $0x2ac] ss:$16 sps:$4 sm:$0xff]  }
  0x70   :  { %1447 = vmatprep.subr.bf16.mxu1 %v2872_v29  ;;  %v2951_v29 = vld [vmem:[#allocation2 + $0x2a8] ss:$16 sps:$4 sm:$0xff]   ;;  %v2956_v30 = vld [vmem:[#allocation2 + $0x4cc] ss:$16 sps:$4 sm:$0xff]  }
  0x72   :  { %1370 = vmatpush1.bf16.msra.mxu0 %v2873_v32  ;;  %v2954_v32 = vld [vmem:[#allocation2 + $0x4c8] ss:$16 sps:$4 sm:$0xff]  }
  0x73   :  { %1448 = vmatpush1.bf16.msra.mxu1 %v2870_v31  ;;  %1371 = vmatprep.subr.bf16.mxu0 %v2881_v34  ;;  %v2959_v31 = vld [vmem:[#allocation2 + $0x28c] ss:$16 sps:$4 sm:$0xff]  }
  0x74   :  { %1449 = vmatprep.subr.bf16.mxu1 %v2878_v33  ;;  %v2957_v33 = vld [vmem:[#allocation2 + $0x288] ss:$16 sps:$4 sm:$0xff]   ;;  %v2962_v34 = vld [vmem:[#allocation2 + $0x4ac] ss:$16 sps:$4 sm:$0xff]  }
  0x76   :  { %1372 = vmatpush1.bf16.msra.mxu0 %v2879_v38  ;;  %v2968_v38 = vld [vmem:[#allocation2 + $0x48c] ss:$16 sps:$4 sm:$0xff]  }
  0x77   :  { %1450 = vmatpush1.bf16.msra.mxu1 %v2876_v37  ;;  %1373 = vmatprep.subr.bf16.mxu0 %v2887_v40  ;;  %v2960_v37 = vld [vmem:[#allocation2 + $0x4a8] ss:$16 sps:$4 sm:$0xff]  }
  0x78   :  { %1451 = vmatprep.subr.bf16.mxu1 %v2884_v39  ;;  %v2971_v39 = vld [vmem:[#allocation2 + $0x24c] ss:$16 sps:$4 sm:$0xff]   ;;  %v2966_v40 = vld [vmem:[#allocation2 + $0x488] ss:$16 sps:$4 sm:$0xff]  }
  0x7a   :  { %1374 = vmatpush1.bf16.msra.mxu0 %v2885_v42  ;;  %v2977_v42 = vld [vmem:[#allocation2 + $0x22c] ss:$16 sps:$4 sm:$0xff]  }
  0x7b   :  { %1452 = vmatpush1.bf16.msra.mxu1 %v2882_v41  ;;  %1375 = vmatprep.subr.bf16.mxu0 %v2893_v44  ;;  %v2974_v41 = vld [vmem:[#allocation2 + $0x46c] ss:$16 sps:$4 sm:$0xff]   ;;  %v2975_v44 = vld [vmem:[#allocation2 + $0x228] ss:$16 sps:$4 sm:$0xff]  }
  0x7c   :  { %1453 = vmatprep.subr.bf16.mxu1 %v2890_v43  ;;  %v2972_v43 = vld [vmem:[#allocation2 + $0x468] ss:$16 sps:$4 sm:$0xff]  }
  0x7e   :  { %1376 = vmatpush2.bf16.msra.mxu0 %v2891_v46  ;;  %v2978_v46 = vld [vmem:[#allocation2 + $0x448] ss:$16 sps:$4 sm:$0xff]  }
  0x7f   :  { %1454 = vmatpush1.bf16.msra.mxu1 %v2888_v45  ;;  %1377 = vmatprep.subr.bf16.mxu0 %v2899_v48  ;;  %v2983_v45 = vld [vmem:[#allocation2 + $0x20c] ss:$16 sps:$4 sm:$0xff]  }
  0x80   :  { %1455 = vmatprep.subr.bf16.mxu1 %v2896_v47  ;;  %v2981_v47 = vld [vmem:[#allocation2 + $0x208] ss:$16 sps:$4 sm:$0xff]   ;;  %v2986_v48 = vld [vmem:[#allocation2 + $0x42c] ss:$16 sps:$4 sm:$0xff]  }
  0x82   :  { %1378 = vmatpush2.bf16.msra.mxu0 %v2897_v50  ;;  %v2984_v50 = vld [vmem:[#allocation2 + $0x428] ss:$16 sps:$4 sm:$0xff]  }
  0x83   :  { %1456 = vmatpush1.bf16.msra.mxu1 %v2894_v49  ;;  %1379 = vmatprep.subr.bf16.mxu0 %v2905_v53  ;;  %v2989_v49 = vld [vmem:[#allocation2 + $0x3ec] ss:$16 sps:$4 sm:$0xff]  }
  0x84   :  { %1457 = vmatprep.subr.bf16.mxu1 %v2902_v51  ;;  %v2987_v51 = vld [vmem:[#allocation2 + $0x3e8] ss:$16 sps:$4 sm:$0xff]   ;;  %v2992_v53 = vld [vmem:[#allocation2 + $0x40c] ss:$16 sps:$4 sm:$0xff]  }
  0x86   :  { %1380 = vmatpush2.bf16.msra.mxu0 %v2903_v55  ;;  %v2990_v55 = vld [vmem:[#allocation2 + $0x408] ss:$16 sps:$4 sm:$0xff]  }
  0x87   :  { %1458 = vmatpush2.bf16.msra.mxu1 %v2900_v54  ;;  %1381 = vmatprep.subr.bf16.mxu0 %v2911_v57  ;;  %v2995_v54 = vld [vmem:[#allocation2 + $0x3cc] ss:$16 sps:$4 sm:$0xff]  }
  0x88   :  { %1459 = vmatprep.subr.bf16.mxu1 %v2908_v56  ;;  %v2993_v56 = vld [vmem:[#allocation2 + $0x3c8] ss:$16 sps:$4 sm:$0xff]   ;;  %v2998_v57 = vld [vmem:[#allocation2 + $0x5ec] ss:$16 sps:$4 sm:$0xff]  }
  0x8a   :  { %1382 = vmatpush2.bf16.msra.mxu0 %v2909_v59  ;;  %v2996_v59 = vld [vmem:[#allocation2 + $0x5e8] ss:$16 sps:$4 sm:$0xff]  }
  0x8b   :  { %1460 = vmatpush2.bf16.msra.mxu1 %v2906_v58  ;;  %1383 = vmatprep.subr.bf16.mxu0 %v2917_v61  ;;  %v3001_v58 = vld [vmem:[#allocation2 + $0x3ac] ss:$16 sps:$4 sm:$0xff]  }
  0x8c   :  { %1461 = vmatprep.subr.bf16.mxu1 %v2914_v60  ;;  %v2999_v60 = vld [vmem:[#allocation2 + $0x3a8] ss:$16 sps:$4 sm:$0xff]   ;;  %v3004_v61 = vld [vmem:[#allocation2 + $0x5cc] ss:$16 sps:$4 sm:$0xff]  }
  0x8e   :  { %1384 = vmatpush2.bf16.msra.mxu0 %v2915_v63  ;;  %v3002_v63 = vld [vmem:[#allocation2 + $0x5c8] ss:$16 sps:$4 sm:$0xff]  }
  0x8f   :  { %1462 = vmatpush2.bf16.msra.mxu1 %v2912_v62  ;;  %1385 = vmatprep.subr.bf16.mxu0 %v2923_v1  ;;  %v3007_v62 = vld [vmem:[#allocation2 + $0x38c] ss:$16 sps:$4 sm:$0xff]  }
  0x90   :  { %1463 = vmatprep.subr.bf16.mxu1 %v2920_v0  ;;  %v3005_v0 = vld [vmem:[#allocation2 + $0x388] ss:$16 sps:$4 sm:$0xff]   ;;  %v3010_v1 = vld [vmem:[#allocation2 + $0x5ac] ss:$16 sps:$4 sm:$0xff]  }
  0x92   :  { %1386 = vmatpush2.bf16.msra.mxu0 %v2921_v3  ;;  %v3008_v3 = vld [vmem:[#allocation2 + $0x5a8] ss:$16 sps:$4 sm:$0xff]  }
  0x93   :  { %1464 = vmatpush2.bf16.msra.mxu1 %v2918_v2  ;;  %1387 = vmatprep.subr.bf16.mxu0 %v2929_v5  ;;  %v3013_v2 = vld [vmem:[#allocation2 + $0x36c] ss:$16 sps:$4 sm:$0xff]  }
  0x94   :  { %1465 = vmatprep.subr.bf16.mxu1 %v2926_v4  ;;  %v3011_v4 = vld [vmem:[#allocation2 + $0x368] ss:$16 sps:$4 sm:$0xff]   ;;  %v3016_v5 = vld [vmem:[#allocation2 + $0x58c] ss:$16 sps:$4 sm:$0xff]  }
  0x96   :  { %1388 = vmatpush2.bf16.msra.mxu0 %v2927_v7  ;;  %v3014_v7 = vld [vmem:[#allocation2 + $0x588] ss:$16 sps:$4 sm:$0xff]  }
  0x97   :  { %1466 = vmatpush2.bf16.msra.mxu1 %v2924_v6  ;;  %1389 = vmatprep.subr.bf16.mxu0 %v2935_v11  ;;  %v3019_v6 = vld [vmem:[#allocation2 + $0x34c] ss:$16 sps:$4 sm:$0xff]  }
  0x98   :  { %1467 = vmatprep.subr.bf16.mxu1 %v2932_v10  ;;  %v3017_v10 = vld [vmem:[#allocation2 + $0x348] ss:$16 sps:$4 sm:$0xff]   ;;  %v3022_v11 = vld [vmem:[#allocation2 + $0x56c] ss:$16 sps:$4 sm:$0xff]  }
  0x9a   :  { %1390 = vmatpush2.bf16.msra.mxu0 %v2933_v13  ;;  %v3020_v13 = vld [vmem:[#allocation2 + $0x568] ss:$16 sps:$4 sm:$0xff]  }
  0x9b   :  { %1468 = vmatpush2.bf16.msra.mxu1 %v2930_v12  ;;  %1482 = vmatprep.subr.bf16.mxu0 %v2941_v17  ;;  %v3025_v12 = vld [vmem:[#allocation2 + $0x32c] ss:$16 sps:$4 sm:$0xff]  }
  0x9c   :  { %1469 = vmatprep.subr.bf16.mxu1 %v2938_v14  ;;  %v3023_v14 = vld [vmem:[#allocation2 + $0x328] ss:$16 sps:$4 sm:$0xff]   ;;  %v3031_v17 = vld [vmem:[#allocation2 + $0x30c] ss:$16 sps:$4 sm:$0xff]  }
  0x9d   :  { %1392 = vmatmul.mubr.bf16.vlgmr.msra.gmra.mxu0 %v3316_v20 }
  0x9e   :  { %1483 = vmatpush1.bf16.msra.mxu0 %v2939_v21  ;;  %1514 = vmatprep.mubr.bf16.mxu0 %v3282_v52  ;;  %v2963_v52 = vld [vmem:[#allocation2 + $0x268] ss:$16 sps:$4 sm:$0xff]  }
  0x9f   :  { %1470 = vmatpush2.bf16.msra.mxu1 %v2936_v18  ;;  %1484 = vmatprep.subr.bf16.mxu0 %v2947_v23  ;;  %v3026_v18 = vld [vmem:[#allocation2 + $0x548] ss:$16 sps:$4 sm:$0xff]   ;;  %v3037_v23 = vld [vmem:[#allocation2 + $0x60c] ss:$16 sps:$4 sm:$0xff]  }
  0xa0   :  { %1471 = vmatprep.subr.bf16.mxu1 %v2944_v22  ;;  %v3029_v21 = vld [vmem:[#allocation2 + $0x308] ss:$16 sps:$4 sm:$0xff]   ;;  %v3034_v22 = vld [vmem:[#allocation2 + $0x52c] ss:$16 sps:$4 sm:$0xff]  }
  0xa2   :  { %1485 = vmatpush1.bf16.msra.mxu0 %v2945_v25  ;;  %v3035_v25 = vld [vmem:[#allocation2 + $0x608] ss:$16 sps:$4 sm:$0xff]  }
  0xa3   :  { %1472 = vmatpush2.bf16.msra.mxu1 %v2942_v24  ;;  %1486 = vmatprep.subr.bf16.mxu0 %v2953_v27  ;;  %v3032_v24 = vld [vmem:[#allocation2 + $0x528] ss:$16 sps:$4 sm:$0xff]   ;;  %v3043_v27 = vld [vmem:[#allocation4 + $0x74] ss:$8 sps:$4 sm:$0xff]  }
  0xa4   :  { %1523 = vmatprep.subr.bf16.mxu1 %v2950_v26  ;;  %v3040_v26 = vld [vmem:[#allocation2 + $0x50c] ss:$16 sps:$4 sm:$0xff]  }
  0xa6   :  { %1474 = vmatmul.mubr.bf16.vlgmr.msra.gmra.mxu1 %v3292_v8  ;;  %1487 = vmatpush1.bf16.msra.mxu0 %v2951_v29  ;;  %v2969_v8 = vld [vmem:[#allocation2 + $0x248] ss:$16 sps:$4 sm:$0xff]  }
  0xa7   :  { %1524 = vmatpush1.bf16.msra.mxu1 %v2948_v28  ;;  %1488 = vmatprep.subr.bf16.mxu0 %v2959_v31  ;;  %v3038_v28 = vld [vmem:[#allocation2 + $0x508] ss:$16 sps:$4 sm:$0xff]  }
  0xa8   :  { %1525 = vmatprep.subr.bf16.mxu1 %v2956_v30  ;;  %1555 = vmatprep.mubr.bf16.mxu1 %v3310_v36  ;;  %v2980_v36 = vld [vmem:[#allocation2 + $0x44c] ss:$16 sps:$4 sm:$0xff]   ;;  %v3041_v29 = vld [vmem:[#allocation4 + $0x70] ss:$8 sps:$4 sm:$0xff]   ;;  %v3044_v31 = vld [vmem:[#allocation4 + $0x60] ss:$8 sps:$4 sm:$0xff]  }
  0xa9   :  { %v3046_v30 = vld [vmem:[#allocation4 + $0x64] ss:$8 sps:$4 sm:$0xff]  }
  0xaa   :  { %1489 = vmatpush1.bf16.msra.mxu0 %v2957_v33  ;;  %v3052_v33 = vld [vmem:[#allocation4 + $0x44] ss:$8 sps:$4 sm:$0xff]  }
  0xab   :  { %1526 = vmatpush1.bf16.msra.mxu1 %v2954_v32  ;;  %1490 = vmatprep.subr.bf16.mxu0 %v2965_v35  ;;  %v3049_v32 = vld [vmem:[#allocation4 + $0x54] ss:$8 sps:$4 sm:$0xff]  }
  0xac   :  { %1527 = vmatprep.subr.bf16.mxu1 %v2962_v34  ;;  %v3089_v34 = vld [vmem:[#allocation4 + $0x170] ss:$8 sps:$4 sm:$0xff]   ;;  %v3091_v35 = vld [vmem:[#allocation4 + $0x174] ss:$8 sps:$4 sm:$0xff]  }
  0xae   :  { %1491 = vmatpush1.bf16.msra.mxu0 %v2963_v52  ;;  %v3092_v52 = vld [vmem:[#allocation4 + $0x160] ss:$8 sps:$4 sm:$0xff]  }
  0xaf   :  { %1528 = vmatpush1.bf16.msra.mxu1 %v2960_v37  ;;  %1492 = vmatprep.subr.bf16.mxu0 %v2971_v39  ;;  %v3050_v37 = vld [vmem:[#allocation4 + $0x40] ss:$8 sps:$4 sm:$0xff]   ;;  %v3095_v39 = vld [vmem:[#allocation4 + $0x150] ss:$8 sps:$4 sm:$0xff]  }
  0xb0   :  { %1529 = vmatprep.subr.bf16.mxu1 %v2968_v38  ;;  %v3053_v38 = vld [vmem:[#allocation4 + $0x30] ss:$8 sps:$4 sm:$0xff]  }
  0xb2   :  { %1493 = vmatpush1.bf16.msra.mxu0 %v2969_v8  ;;  %v3100_v8 = vld [vmem:[#allocation4 + $0x144] ss:$8 sps:$4 sm:$0xff]  }
  0xb3   :  { %1530 = vmatpush1.bf16.msra.mxu1 %v2966_v40  ;;  %1494 = vmatprep.subr.bf16.mxu0 %v2977_v42  ;;  %v3058_v40 = vld [vmem:[#allocation4 + $0x24] ss:$8 sps:$4 sm:$0xff]   ;;  %v3098_v42 = vld [vmem:[#allocation4 + $0x140] ss:$8 sps:$4 sm:$0xff]  }
  0xb4   :  { %1531 = vmatprep.subr.bf16.mxu1 %v2974_v41  ;;  %v3056_v41 = vld [vmem:[#allocation4 + $0x20] ss:$8 sps:$4 sm:$0xff]  }
  0xb6   :  { %1495 = vmatpush1.bf16.msra.mxu0 %v2975_v44  ;;  %v3103_v44 = vld [vmem:[#allocation4 + $0x134] ss:$8 sps:$4 sm:$0xff]  }
  0xb7   :  { %1532 = vmatpush1.bf16.msra.mxu1 %v2972_v43  ;;  %1496 = vmatprep.subr.bf16.mxu0 %v2983_v45  ;;  %v3061_v43 = vld [vmem:[#allocation4 + $0x14] ss:$8 sps:$4 sm:$0xff]   ;;  %v3101_v45 = vld [vmem:[#allocation4 + $0x130] ss:$8 sps:$4 sm:$0xff]  }
  0xb8   :  { %1533 = vmatprep.subr.bf16.mxu1 %v2980_v36  ;;  %v3059_v36 = vld [vmem:[#allocation4 + $0x10] ss:$8 sps:$4 sm:$0xff]  }
  0xba   :  { %1497 = vmatpush1.bf16.msra.mxu0 %v2981_v47  ;;  %v3106_v47 = vld [vmem:[#allocation4 + $0x124] ss:$8 sps:$4 sm:$0xff]  }
  0xbb   :  { %1534 = vmatpush1.bf16.msra.mxu1 %v2978_v46  ;;  %1498 = vmatprep.subr.bf16.mxu0 %v2989_v49  ;;  %v3064_v46 = vld [vmem:[#allocation4 + $0x4] ss:$8 sps:$4 sm:$0xff]   ;;  %v3104_v49 = vld [vmem:[#allocation4 + $0x120] ss:$8 sps:$4 sm:$0xff]  }
  0xbc   :  { %1535 = vmatprep.subr.bf16.mxu1 %v2986_v48  ;;  %v3062_v48 = vld [vmem:[#allocation4] ss:$8 sps:$4 sm:$0xff]  }
  0xbe   :  { %1499 = vmatpush2.bf16.msra.mxu0 %v2987_v51  ;;  %v3109_v51 = vld [vmem:[#allocation4 + $0x114] ss:$8 sps:$4 sm:$0xff]  }
  0xbf   :  { %1536 = vmatpush1.bf16.msra.mxu1 %v2984_v50  ;;  %1500 = vmatprep.subr.bf16.mxu0 %v2995_v54  ;;  %v3067_v50 = vld [vmem:[#allocation4 + $0xf4] ss:$8 sps:$4 sm:$0xff]   ;;  %v3107_v54 = vld [vmem:[#allocation4 + $0x110] ss:$8 sps:$4 sm:$0xff]  }
  0xc0   :  { %1537 = vmatprep.subr.bf16.mxu1 %v2992_v53  ;;  %v3065_v53 = vld [vmem:[#allocation4 + $0xf0] ss:$8 sps:$4 sm:$0xff]  }
  0xc2   :  { %1501 = vmatpush2.bf16.msra.mxu0 %v2993_v56  ;;  %v3112_v56 = vld [vmem:[#allocation4 + $0x104] ss:$8 sps:$4 sm:$0xff]  }
  0xc3   :  { %1538 = vmatpush1.bf16.msra.mxu1 %v2990_v55  ;;  %1502 = vmatprep.subr.bf16.mxu0 %v3001_v58  ;;  %v3070_v55 = vld [vmem:[#allocation4 + $0xe4] ss:$8 sps:$4 sm:$0xff]   ;;  %v3110_v58 = vld [vmem:[#allocation4 + $0x100] ss:$8 sps:$4 sm:$0xff]  }
  0xc4   :  { %1539 = vmatprep.subr.bf16.mxu1 %v2998_v57  ;;  %v3068_v57 = vld [vmem:[#allocation4 + $0xe0] ss:$8 sps:$4 sm:$0xff]  }
  0xc6   :  { %1503 = vmatpush2.bf16.msra.mxu0 %v2999_v60  ;;  %v3115_v60 = vld [vmem:[#allocation4 + $0x1f4] ss:$8 sps:$4 sm:$0xff]  }
  0xc7   :  { %1540 = vmatpush2.bf16.msra.mxu1 %v2996_v59  ;;  %1504 = vmatprep.subr.bf16.mxu0 %v3007_v62  ;;  %v3073_v59 = vld [vmem:[#allocation4 + $0xd4] ss:$8 sps:$4 sm:$0xff]   ;;  %v3113_v62 = vld [vmem:[#allocation4 + $0x1f0] ss:$8 sps:$4 sm:$0xff]  }
  0xc8   :  { %1541 = vmatprep.subr.bf16.mxu1 %v3004_v61  ;;  %v3071_v61 = vld [vmem:[#allocation4 + $0xd0] ss:$8 sps:$4 sm:$0xff]  }
  0xca   :  { %1505 = vmatpush2.bf16.msra.mxu0 %v3005_v0  ;;  %v3118_v0 = vld [vmem:[#allocation4 + $0x1e4] ss:$8 sps:$4 sm:$0xff]  }
  0xcb   :  { %1542 = vmatpush2.bf16.msra.mxu1 %v3002_v63  ;;  %1506 = vmatprep.subr.bf16.mxu0 %v3013_v2  ;;  %v3076_v63 = vld [vmem:[#allocation4 + $0xc4] ss:$8 sps:$4 sm:$0xff]   ;;  %v3116_v2 = vld [vmem:[#allocation4 + $0x1e0] ss:$8 sps:$4 sm:$0xff]  }
  0xcc   :  { %1543 = vmatprep.subr.bf16.mxu1 %v3010_v1  ;;  %v3074_v1 = vld [vmem:[#allocation4 + $0xc0] ss:$8 sps:$4 sm:$0xff]  }
  0xce   :  { %1507 = vmatpush2.bf16.msra.mxu0 %v3011_v4  ;;  %v3121_v4 = vld [vmem:[#allocation4 + $0x1d4] ss:$8 sps:$4 sm:$0xff]  }
  0xcf   :  { %1544 = vmatpush2.bf16.msra.mxu1 %v3008_v3  ;;  %1508 = vmatprep.subr.bf16.mxu0 %v3019_v6  ;;  %v3079_v3 = vld [vmem:[#allocation4 + $0xb4] ss:$8 sps:$4 sm:$0xff]   ;;  %v3119_v6 = vld [vmem:[#allocation4 + $0x1d0] ss:$8 sps:$4 sm:$0xff]  }
  0xd0   :  { %1545 = vmatprep.subr.bf16.mxu1 %v3016_v5  ;;  %v3077_v5 = vld [vmem:[#allocation4 + $0xb0] ss:$8 sps:$4 sm:$0xff]  }
  0xd2   :  { %1509 = vmatpush2.bf16.msra.mxu0 %v3017_v10  ;;  %v3124_v10 = vld [vmem:[#allocation4 + $0x1c4] ss:$8 sps:$4 sm:$0xff]  }
  0xd3   :  { %1546 = vmatpush2.bf16.msra.mxu1 %v3014_v7  ;;  %1510 = vmatprep.subr.bf16.mxu0 %v3025_v12  ;;  %v3082_v7 = vld [vmem:[#allocation4 + $0xa4] ss:$8 sps:$4 sm:$0xff]   ;;  %v3122_v12 = vld [vmem:[#allocation4 + $0x1c0] ss:$8 sps:$4 sm:$0xff]  }
  0xd4   :  { %1547 = vmatprep.subr.bf16.mxu1 %v3022_v11  ;;  %v3080_v11 = vld [vmem:[#allocation4 + $0xa0] ss:$8 sps:$4 sm:$0xff]  }
  0xd6   :  { %1511 = vmatpush2.bf16.msra.mxu0 %v3023_v14  ;;  %v3083_v14 = vld [vmem:[#allocation4 + $0x90] ss:$8 sps:$4 sm:$0xff]  }
  0xd7   :  { %1548 = vmatpush2.bf16.msra.mxu1 %v3020_v13  ;;  %1512 = vmatprep.subr.bf16.mxu0 %v3031_v17  ;;  %v3085_v13 = vld [vmem:[#allocation4 + $0x94] ss:$8 sps:$4 sm:$0xff]  }
  0xd8   :  { %1549 = vmatprep.subr.bf16.mxu1 %v3028_v15  ;;  %v3088_v15 = vld [vmem:[#allocation4 + $0x84] ss:$8 sps:$4 sm:$0xff]  }
  0xda   :  { %1513 = vmatpush2.bf16.msra.mxu0 %v3029_v21  ;;  %v3086_v21 = vld [vmem:[#allocation4 + $0x80] ss:$8 sps:$4 sm:$0xff]  }
  0xdb   :  { %1550 = vmatpush2.bf16.msra.mxu1 %v3026_v18  ;;  %1578 = vmatprep.subr.bf16.mxu0 %v3037_v23 }
  0xdc   :  { %1551 = vmatprep.subr.bf16.mxu1 %v3034_v22 }
  0xdd   :  { %1515 = vmatmul.mubr.bf16.vlgmr.msra.gmra.mxu0 %v3294_v9  ;;  %v3047_v9 = vld [vmem:[#allocation4 + $0x50] ss:$8 sps:$4 sm:$0xff]  }
  0xde   :  { %1579 = vmatpush1.bf16.msra.mxu0 %v3035_v25  ;;  %1596 = vmatprep.mubr.bf16.mxu0 %v3215_v16  ;;  %v3094_v16 = vld [vmem:[#allocation4 + $0x164] ss:$8 sps:$4 sm:$0xff]   ;;  %v3125_v25 = vld [vmem:[#allocation4 + $0x1b0] ss:$8 sps:$4 sm:$0xff]  }
  0xdf   :  { %1552 = vmatpush2.bf16.msra.mxu1 %v3032_v24  ;;  %2009 = vmatprep.subr.bf16.mxu0 %v3043_v27  ;;  %v3127_v24 = vld [vmem:[#allocation4 + $0x1b4] ss:$8 sps:$4 sm:$0xff]  }
  0xe0   :  { %1553 = vmatprep.subr.bf16.mxu1 %v3040_v26 }
  0xe3   :  { %1554 = vmatpush2.bf16.msra.mxu1 %v3038_v28 }
  0xe4   :  { %2050 = vmatprep.subr.bf16.mxu1 %v3091_v35 }
  0xe5   :  { %2596 = vmatmul.mubr.msk.bf16.vlgmr.msra.gmra.mxu0 %vm1273_vm0, %v3302_v19  ;;  %v3097_v19 = vld [vmem:[#allocation4 + $0x154] ss:$8 sps:$4 sm:$0xff]  }
  0xe6   :  { %1556 = vmatmul.mubr.bf16.vlgmr.msra.gmra.mxu1 %v3316_v20  ;;  %2010 = vmatpush1.bf16.msra.mxu0 %v3041_v29  ;;  %v3055_v20 = vld [vmem:[#allocation4 + $0x34] ss:$8 sps:$4 sm:$0xff]  }
  0xe7   :  { %2011 = vmatprep.subr.bf16.mxu0 %v3046_v30  ;;  %2051 = vmatpush1.bf16.msra.mxu1 %v3089_v34  ;;  %v3130_v30 = vld [vmem:[#allocation4 + $0x1a4] ss:$8 sps:$4 sm:$0xff]   ;;  %v3131_v34 = vld [vmem:[#allocation4 + $0x190] ss:$8 sps:$4 sm:$0xff]  }
  0xe8   :  { %2052 = vmatprep.subr.bf16.mxu1 %v3094_v16 }
  0xea   :  { %2012 = vmatpush1.bf16.msra.mxu0 %v3044_v31  ;;  %v3128_v31 = vld [vmem:[#allocation4 + $0x1a0] ss:$8 sps:$4 sm:$0xff]  }
  0xeb   :  { %2013 = vmatprep.subr.bf16.mxu0 %v3049_v32  ;;  %2053 = vmatpush1.bf16.msra.mxu1 %v3092_v52  ;;  %v3134_v52 = vld [vmem:[#allocation4 + $0x180] ss:$8 sps:$4 sm:$0xff]  }
  0xec   :  { %2054 = vmatprep.subr.bf16.mxu1 %v3097_v19 }
  0xee   :  { %2014 = vmatpush1.bf16.msra.mxu0 %v3047_v9 }
  0xef   :  { %2015 = vmatprep.subr.bf16.mxu0 %v3052_v33  ;;  %2055 = vmatpush1.bf16.msra.mxu1 %v3095_v39  ;;  %v3133_v33 = vld [vmem:[#allocation4 + $0x194] ss:$8 sps:$4 sm:$0xff]   ;;  %v271_v39 = vld [vmem:[%s3430_s2] sm:$0xf] }
  0xf0   :  { %2056 = vmatprep.subr.bf16.mxu1 %v3100_v8 }
  0xf2   :  { %2016 = vmatpush1.bf16.msra.mxu0 %v3050_v37  ;;  %v3136_v37 = vld [vmem:[#allocation4 + $0x184] ss:$8 sps:$4 sm:$0xff]  }
  0xf3   :  { %2017 = vmatprep.subr.bf16.mxu0 %v3055_v20  ;;  %2057 = vmatpush1.bf16.msra.mxu1 %v3098_v42  ;;  %v273_v20 = vlaneseq }
  0xf4   :  { %2058 = vmatprep.subr.bf16.mxu1 %v3103_v44 }
  0xf5   :  { %v3327_v19 = vshrl.u32 %v273_v20, 7  ;;  %v3146_v20 = vld [vmem:[%s3433_s5 + $0x18] sm:$0xff]  }
  0xf6   :  { %2018 = vmatpush1.bf16.msra.mxu0 %v3053_v38 }
  0xf7   :  { %2019 = vmatprep.subr.bf16.mxu0 %v3058_v40  ;;  %2059 = vmatpush1.bf16.msra.mxu1 %v3101_v45  ;;  %v275_v38 = vsub.s32 0, %v3327_v19  ;;  %v279_v40 = vsub.s32 1, %v3327_v19 }
  0xf8   :  { %2060 = vmatprep.subr.bf16.mxu1 %v3106_v47 }
  0xf9   :  { %v276_v8 = vrot.slane %v271_v39, %v275_v38 }
  0xfa   :  { %2020 = vmatpush1.bf16.msra.mxu0 %v3056_v41  ;;  %v280_v41 = vrot.slane %v271_v39, %v279_v40 }
  0xfb   :  { %2021 = vmatprep.subr.bf16.mxu0 %v3061_v43  ;;  %2061 = vmatpush1.bf16.msra.mxu1 %v3104_v49 }
  0xfc   :  { %2062 = vmatprep.subr.bf16.mxu1 %v3109_v51 }
  0xfe   :  { %2022 = vmatpush1.bf16.msra.mxu0 %v3059_v36 }
  0xff   :  { %2023 = vmatprep.subr.bf16.mxu0 %v3064_v46  ;;  %2063 = vmatpush1.bf16.msra.mxu1 %v3107_v54 }
 0x100   :  { %2064 = vmatprep.subr.bf16.mxu1 %v3112_v56 }
 0x102   :  { %2024 = vmatpush1.bf16.msra.mxu0 %v3062_v48 }
 0x103   :  { %2025 = vmatprep.subr.bf16.mxu0 %v3067_v50  ;;  %2065 = vmatpush1.bf16.msra.mxu1 %v3110_v58 }
 0x104   :  { %2066 = vmatprep.subr.bf16.mxu1 %v3115_v60 }
 0x106   :  { %2026 = vmatpush2.bf16.msra.mxu0 %v3065_v53 }
 0x107   :  { %2027 = vmatprep.subr.bf16.mxu0 %v3070_v55  ;;  %2067 = vmatpush2.bf16.msra.mxu1 %v3113_v62  ;;  %v283_v62 = vsub.s32 2, %v3327_v19 }
 0x108   :  { %2068 = vmatprep.subr.bf16.mxu1 %v3118_v0 }
 0x10a   :  { %2028 = vmatpush2.bf16.msra.mxu0 %v3068_v57 }
 0x10b   :  { %2029 = vmatprep.subr.bf16.mxu0 %v3073_v59  ;;  %2069 = vmatpush2.bf16.msra.mxu1 %v3116_v2 }
 0x10c   :  { %2070 = vmatprep.subr.bf16.mxu1 %v3121_v4 }
 0x10e   :  { %2030 = vmatpush2.bf16.msra.mxu0 %v3071_v61 }
 0x10f   :  { %2031 = vmatprep.subr.bf16.mxu0 %v3076_v63  ;;  %2071 = vmatpush2.bf16.msra.mxu1 %v3119_v6  ;;  %v287_v63 = vsub.s32 3, %v3327_v19  ;;  %v3159_v19 = vld [vmem:[%s3435_s7 + $0x8] sm:$0xff]  }
 0x110   :  { %2072 = vmatprep.subr.bf16.mxu1 %v3124_v10 }
 0x112   :  { %2032 = vmatpush2.bf16.msra.mxu0 %v3074_v1  ;;  %v284_v1 = vrot.slane %v271_v39, %v283_v62 }
 0x113   :  { %2033 = vmatprep.subr.bf16.mxu0 %v3079_v3  ;;  %2073 = vmatpush2.bf16.msra.mxu1 %v3122_v12  ;;  %v288_v3 = vrot.slane %v271_v39, %v287_v63  ;;  %v3147_v39 = vld [vmem:[%s3433_s5 + $0x50] sm:$0xff]  }
 0x114   :  { %2074 = vmatprep.subr.bf16.mxu1 %v3127_v24 }
 0x116   :  { %2034 = vmatpush2.bf16.msra.mxu0 %v3077_v5 }
 0x117   :  { %2035 = vmatprep.subr.bf16.mxu0 %v3082_v7  ;;  %2075 = vmatpush2.bf16.msra.mxu1 %v3125_v25 }
 0x118   :  { %2076 = vmatprep.subr.bf16.mxu1 %v3130_v30 }
 0x11a   :  { %2036 = vmatpush2.bf16.msra.mxu0 %v3080_v11 }
 0x11b   :  { %2037 = vmatprep.subr.bf16.mxu0 %v3085_v13  ;;  %2077 = vmatpush2.bf16.msra.mxu1 %v3128_v31  ;;  %v3137_v31 = vld [vmem:[%s3433_s5 + $0x78] sm:$0xff]  }
 0x11c   :  { %2078 = vmatprep.subr.bf16.mxu1 %v3133_v33  ;;  %v3140_v33 = vld [vmem:[%s3433_s5 + $0x30] sm:$0xff]  }
 0x11d   :  { %v1311_v17 = vpop.f32.mrf.mxu0 }
 0x11e   :  { %v1352_v18 = vpop.f32.mrf.mxu1  ;;  %2038 = vmatpush2.bf16.msra.mxu0 %v3083_v14  ;;  %v1312_v42 = vadd.f32 %v1311_v17, %v276_v8  ;;  %v3148_v8 = vld [vmem:[%s3433_s5 + $0x10] sm:$0xff]  }
 0x11f   :  { %v1313_v22 = vpop.f32.mrf.mxu0  ;;  %2039 = vmatprep.subr.bf16.mxu0 %v3088_v15  ;;  %2079 = vmatpush2.bf16.msra.mxu1 %v3131_v34  ;;  %v3141_v34 = vld [vmem:[%s3433_s5 + $0x68] sm:$0xff]  }
 0x120   :  { %v1354_v23 = vpop.f32.mrf.mxu1  ;;  %2080 = vmatprep.subr.bf16.mxu1 %v3136_v37  ;;  %v1314_v43 = vadd.f32 %v1313_v22, %v280_v41  ;;  %v1353_v44 = vadd.f32 %v1352_v18, %v1312_v42  ;;  %v3144_v37 = vld [vmem:[%s3433_s5 + $0x20] sm:$0xff]   ;;  %v3149_v41 = vld [vmem:[%s3433_s5 + $0x48] sm:$0xff]  }
 0x121   :  { %v1315_v26 = vpop.f32.mrf.mxu0  ;;  %v3150_v42 = vld [vmem:[%s3433_s5 + $0x8] sm:$0xff]  }
 0x122   :  { %v1356_v27 = vpop.f32.mrf.mxu1  ;;  %2040 = vmatpush2.bf16.msra.mxu0 %v3086_v21  ;;  %v1355_v45 = vadd.f32 %v1354_v23, %v1314_v43  ;;  %v3151_v43 = vld [vmem:[%s3433_s5 + $0x40] sm:$0xff]  }
 0x123   :  { %v1316_v28 = vpop.f32.mrf.mxu0  ;;  %2081 = vmatpush2.bf16.msra.mxu1 %v3134_v52  ;;  %2687 = vmatprep.subr.bf16.mxu0 %v3137_v31  ;;  %v3145_v52 = vld [vmem:[%s3433_s5 + $0x58] sm:$0xff]  }
 0x124   :  { %v1357_v29 = vpop.f32.mrf.mxu1 }
 0x126   :  { %v1434_v32 = vpop.f32.mrf.mxu1 }
 0x128   :  { %v1436_v9 = vpop.f32.mrf.mxu1 }
 0x12a   :  { %v1438_v35 = vpop.f32.mrf.mxu1 }
 0x12b   :  { %v3142_v35 = vld [vmem:[%s3433_s5 + $0x28] sm:$0xff]  }
 0x12c   :  { %v1439_v16 = vpop.f32.mrf.mxu1 }
 0x12d   :  { %v3143_v16 = vld [vmem:[%s3433_s5 + $0x60] sm:$0xff]  }
 0x15d   :  { %v1393_v36 = vpop.f32.mrf.mxu0 }
 0x15e   :  { %v1394_v46 = vadd.f32 %v1393_v36, %v1353_v44  ;;  %v3152_v44 = vld [vmem:[%s3433_s5] sm:$0xff]   ;;  %v3153_v36 = vld [vmem:[%s3435_s7 + $0x38] sm:$0xff]  }
 0x15f   :  { %v1395_v47 = vpop.f32.mrf.mxu0 }
 0x160   :  { %v1435_v48 = vadd.f32 %v1434_v32, %v1394_v46  ;;  %v1396_v49 = vadd.f32 %v1395_v47, %v1355_v45  ;;  %v3138_v32 = vld [vmem:[%s3433_s5 + $0x38] sm:$0xff]   ;;  %v3216_v45 = vmov 0.0   ;;  %v3154_v46 = vld [vmem:[%s3435_s7 + $0x30] sm:$0xff]   ;;  %v3155_v47 = vld [vmem:[%s3435_s7 + $0x28] sm:$0xff]  }
 0x161   :  { %v1397_v50 = vpop.f32.mrf.mxu0  ;;  %2718 = vmatprep.subr.bf16.mxu1 %v3216_v45 }
 0x162   :  { %v1437_v51 = vadd.f32 %v1436_v9, %v1396_v49  ;;  %v1605_v53 = vmax.f32 %v1435_v48, 0.0  ;;  %v3139_v9 = vld [vmem:[%s3433_s5 + $0x70] sm:$0xff]   ;;  %v3156_v48 = vld [vmem:[%s3435_s7 + $0x20] sm:$0xff]   ;;  %v3157_v49 = vld [vmem:[%s3435_s7 + $0x18] sm:$0xff]  }
 0x163   :  { %v1398_v54 = vpop.f32.mrf.mxu0 }
 0x164   :  { %v1606_v55 = vmax.f32 %v1437_v51, 0.0  ;;  %v1609_v58 = vpack.c.bf16 %v1605_v53, %v1605_v53 }
 0x166   :  { %v1475_v56 = vpop.f32.mrf.mxu1  ;;  %v1610_v57 = vpack.c.bf16 %v1606_v55, %v1606_v55  ;;  %v1677_v55 = vld [vmem:[%s3432_s4] sm:$0x3] }
 0x167   :  { %v1476_v5 = vadd.f32 %v1475_v56, %v284_v1  ;;  %v1682_v56 = vrot.slane %v1677_v55, %v275_v38  ;;  %v3158_v38 = vld [vmem:[%s3435_s7 + $0x10] sm:$0xff]  }
 0x168   :  { %v1477_v59 = vpop.f32.mrf.mxu1  ;;  %2041 = vmatprep.mubr.bf16.mxu0 %v1610_v57  ;;  %v1686_v57 = vrot.slane %v1677_v55, %v279_v40  ;;  %v3160_v40 = vld [vmem:[%s3435_s7] sm:$0xff]  }
 0x169   :  { %2042 = vmatmul.mubr.bf16.vlgmr.msra.gmra.mxu0 %v1609_v58  ;;  %v1478_v7 = vadd.f32 %v1477_v59, %v288_v3 }
 0x16a   :  { %v1479_v60 = vpop.f32.mrf.mxu1  ;;  %2688 = vmatpush3.bf16.msra.mxu0 %v3138_v32 }
 0x16b   :  { %2689 = vmatprep.subr.bf16.mxu0 %v3139_v9 }
 0x16c   :  { %v1480_v61 = vpop.f32.mrf.mxu1 }
 0x16e   :  { %2690 = vmatpush3.bf16.msra.mxu0 %v3140_v33 }
 0x16f   :  { %2691 = vmatprep.subr.bf16.mxu0 %v3141_v34 }
 0x172   :  { %2692 = vmatpush3.bf16.msra.mxu0 %v3142_v35 }
 0x173   :  { %2693 = vmatprep.subr.bf16.mxu0 %v3143_v16 }
 0x176   :  { %2694 = vmatpush3.bf16.msra.mxu0 %v3144_v37 }
 0x177   :  { %2695 = vmatprep.subr.bf16.mxu0 %v3145_v52 }
 0x17a   :  { %2696 = vmatpush3.bf16.msra.mxu0 %v3146_v20 }
 0x17b   :  { %2697 = vmatprep.subr.bf16.mxu0 %v3147_v39 }
 0x17e   :  { %2698 = vmatpush3.bf16.msra.mxu0 %v3148_v8 }
 0x17f   :  { %2699 = vmatprep.subr.bf16.mxu0 %v3149_v41 }
 0x182   :  { %2700 = vmatpush3.bf16.msra.mxu0 %v3150_v42 }
 0x183   :  { %2701 = vmatprep.subr.bf16.mxu0 %v3151_v43 }
 0x186   :  { %2702 = vmatpush3.bf16.msra.mxu0 %v3152_v44 }
 0x19d   :  { %v1516_v0 = vpop.f32.mrf.mxu0 }
 0x19e   :  { %v1517_v10 = vadd.f32 %v1516_v0, %v1476_v5 }
 0x19f   :  { %v1518_v2 = vpop.f32.mrf.mxu0 }
 0x1a0   :  { %v1519_v13 = vadd.f32 %v1518_v2, %v1478_v7  ;;  %v2661_v7 = vld [vmem:[%s3434_s6] ss:$0 sm:$0xff] }
 0x1a1   :  { %v1520_v4 = vpop.f32.mrf.mxu0 }
 0x1a3   :  { %v1521_v6 = vpop.f32.mrf.mxu0 }
 0x1a5   :  { %v1598_v12 = vpop.f32.mrf.mxu0 }
 0x1a6   :  { %v1557_v11 = vpop.f32.mrf.mxu1 }
 0x1a7   :  { %v1558_v14 = vadd.f32 %v1557_v11, %v1517_v10  ;;  %v1600_v17 = vpop.f32.mrf.mxu0 }
 0x1a8   :  { %v1559_v15 = vpop.f32.mrf.mxu1 }
 0x1a9   :  { %v1599_v18 = vadd.f32 %v1598_v12, %v1558_v14  ;;  %v1560_v21 = vadd.f32 %v1559_v15, %v1519_v13  ;;  %v1602_v23 = vpop.f32.mrf.mxu0 }
 0x1aa   :  { %v1561_v22 = vpop.f32.mrf.mxu1 }
 0x1ab   :  { %v1601_v24 = vadd.f32 %v1600_v17, %v1560_v21  ;;  %v1607_v25 = vmax.f32 %v1599_v18, 0.0  ;;  %v1603_v27 = vpop.f32.mrf.mxu0  ;;  %v2678_v18 = vld [vmem:[%s3436_s8] ss:$0 sm:$0xff] }
 0x1ac   :  { %v1562_v26 = vpop.f32.mrf.mxu1 }
 0x1ad   :  { %v1608_v28 = vmax.f32 %v1601_v24, 0.0  ;;  %v1611_v30 = vpack.c.bf16 %v1607_v25, %v1607_v25 }
 0x1af   :  { %v1612_v29 = vpack.c.bf16 %v1608_v28, %v1608_v28 }
 0x1b1   :  { %2082 = vmatprep.mubr.bf16.mxu1 %v1612_v29 }
 0x1b2   :  { %2083 = vmatmul.mubr.bf16.vlgmr.msra.gmra.mxu1 %v1611_v30 }
 0x1b3   :  { %2719 = vmatpush3.bf16.msra.mxu1 %v3153_v36  ;;  %2734 = vmatprep.mubr.msk.bf16.mxu1 %vm3217_vm1, %v3216_v45 }
 0x1b4   :  { %2720 = vmatprep.subr.bf16.mxu1 %v3216_v45 }
 0x1b7   :  { %2721 = vmatpush3.bf16.msra.mxu1 %v3154_v46 }
 0x1b8   :  { %2722 = vmatprep.subr.bf16.mxu1 %v3216_v45 }
 0x1bb   :  { %2723 = vmatpush3.bf16.msra.mxu1 %v3155_v47 }
 0x1bc   :  { %2724 = vmatprep.subr.bf16.mxu1 %v3216_v45 }
 0x1bf   :  { %2725 = vmatpush3.bf16.msra.mxu1 %v3156_v48 }
 0x1c0   :  { %2726 = vmatprep.subr.bf16.mxu1 %v3216_v45 }
 0x1c3   :  { %2727 = vmatpush3.bf16.msra.mxu1 %v3157_v49 }
 0x1c4   :  { %2728 = vmatprep.subr.bf16.mxu1 %v3216_v45 }
 0x1c7   :  { %2729 = vmatpush3.bf16.msra.mxu1 %v3158_v38 }
 0x1c8   :  { %2730 = vmatprep.subr.bf16.mxu1 %v3216_v45 }
 0x1cb   :  { %2731 = vmatpush3.bf16.msra.mxu1 %v3159_v19 }
 0x1cc   :  { %2732 = vmatprep.subr.bf16.mxu1 %v3216_v45 }
 0x1cf   :  { %2733 = vmatpush3.bf16.msra.mxu1 %v3160_v40 }
 0x229   :  { %v2043_v50 = vpop.f32.mrf.mxu0 }
 0x22a   :  { %v2044_v58 = vadd.f32 %v2043_v50, %v1682_v56 }
 0x22b   :  { %v2045_v51 = vpop.f32.mrf.mxu0 }
 0x22c   :  { %v2046_v60 = vadd.f32 %v2045_v51, %v1686_v57 }
 0x22d   :  { %v2047_v53 = vpop.f32.mrf.mxu0 }
 0x22f   :  { %v2048_v54 = vpop.f32.mrf.mxu0 }
 0x272   :  { %v2084_v59 = vpop.f32.mrf.mxu1 }
 0x273   :  { %v2085_v61 = vadd.f32 %v2084_v59, %v2044_v58 }
 0x274   :  { %v2086_v62 = vpop.f32.mrf.mxu1 }
 0x275   :  { %v2087_v63 = vadd.f32 %v2086_v62, %v2046_v60  ;;  %v2091_v0 = vmax.f32 %v2085_v61, 0.0 }
 0x276   :  { %v2088_v1 = vpop.f32.mrf.mxu1 }
 0x277   :  { %v2092_v2 = vmax.f32 %v2087_v63, 0.0  ;;  %v2093_v5 = vpack.c.bf16 %v2091_v0, %v2091_v0 }
 0x278   :  { %v2089_v3 = vpop.f32.mrf.mxu1 }
 0x279   :  { %v2094_v4 = vpack.c.bf16 %v2092_v2, %v2092_v2 }
 0x27b   :  { %2262 = vmatprep.mubr.bf16.mxu0 %v2094_v4 }
 0x27c   :  { %2263 = vmatmul.mubr.bf16.vlgmr.msra.gmra.mxu0 %v2093_v5 }
 0x33c   :  { %v2703_v6 = vpop.f32.mrf.mxu0 }
 0x33e   :  { %v2704_v10 = vpop.f32.mrf.mxu0 }
 0x33f   :  { %v2705_v11 = vadd.f32 %v2704_v10, %v2703_v6 }
 0x340   :  { %v2706_v12 = vpop.f32.mrf.mxu0 }
 0x341   :  { %v2265_v13 = vadd.f32 %v2705_v11, %v2661_v7 }
 0x342   :  { %v2707_v14 = vpop.f32.mrf.mxu0 }
 0x343   :  { %v2270_v15 = vmax.f32 %v2265_v13, 0.0 }
 0x345   :  { %v2271_v17 = vpack.c.bf16 %v2270_v15, %v2270_v15 }
 0x347   :  { %2735 = vmatmul.mubr.bf16.vlgmr.msra.gmra.mxu1 %v2271_v17 }
 0x407   :  { %v2377_v21 = vpop.f32.mrf.mxu1 }
 0x408   :  { %v2378_v22 = vadd.f32 %v2678_v18, %v2377_v21 }
 0x409   :  { %v2736_v23 = vpop.f32.mrf.mxu1 }
 0x40a   :  { %2383 = vmax.xlane.f32.xlu0 %v2378_v22 }
 0x40b   :  { %v2380_v24 = vpop.f32.mrf.mxu1 }
 0x40d   :  { %v2737_v25 = vpop.f32.mrf.mxu1 }
 0x493   :  { %v2384_v26 = vpop.xlane.xlu0 %2383 }
 0x494   :  { %v2385_v27 = vsub.f32 %v2378_v22, %v2384_v26 }
 0x496   :  { %v2386_v28 = vmul.f32 1.442695, %v2385_v27 }
 0x498   :  { %3161 = vpow2.f32 %v2386_v28 }
 0x4a5   :  { %v3162_v29 = vpop.eup %3161 }
 0x4a6   :  { %2388 = vadd.xlane.f32.xlu0 %v3162_v29 }
 0x52f   :  { %v2389_v30 = vpop.xlane.xlu0 %2388 }
 0x530   :  { %3163 = vrcp.f32 %v2389_v30 }
 0x53d   :  { %v3164_v31 = vpop.eup %3163 }
 0x53e   :  { %v2391_v32 = vmul.f32 %v3164_v31, %v3162_v29 }
 0x540   :  { %2392 = vst [vmem:[%s3437_s9] sm:$0xff] %v2391_v32 }
 0x541   :  { %2397 = vsyncpa [#allocation3], 1 }
 0x542   :  { %2398 = vsyncpa [#allocation5], 1 }

</bundles_post_ra>
